<compile_context>
chip_gen: v7x
topology: tpu7x:2x2x1
jax: 0.10.0
libtpu: 0.0.40
codegen_flags: <defaults>
</compile_context>

<pallas_src>
import functools

import jax
import jax.numpy as jnp
from jax.experimental import pallas as pl
from jax.experimental.pallas import tpu as pltpu  # noqa: F401  (kept for TPU-specific tuning hooks)

D_MODEL = 64
NHEAD = 4
DIM_FF = 256
NUM_LAYERS = 2
HEAD_DIM = D_MODEL // NHEAD
LN_EPS = 1e-5


# ---------------------------------------------------------------------------
# Fused kernel: 2 encoder layers + final linear, one pallas_call, no grid.
# ---------------------------------------------------------------------------
def _layer_norm(x, gamma, beta):
    mu = jnp.mean(x, axis=-1, keepdims=True)
    var = jnp.mean(jnp.square(x - mu), axis=-1, keepdims=True)
    return (x - mu) * jax.lax.rsqrt(var + LN_EPS) * gamma + beta


def fused_encoder_kernel(x_ref,
                         wqkv_ref, bqkv_ref, wo_ref, bo_ref,
                         g1_ref, be1_ref,
                         w1_ref, b1_ref, w2_ref, b2_ref,
                         g2_ref, be2_ref,
                         wout_ref, bout_ref,
                         o_ref,
                         *, batch, seq):
    B, S, D = batch, seq, D_MODEL
    scale = 1.0 / (HEAD_DIM ** 0.5)

    x = x_ref[...].astype(jnp.float32)                       # (B*S, D)

    for l in range(NUM_LAYERS):                              # static unroll (2)
        # ---- fused QKV projection: one (B*S, D) @ (D, 3D) matmul ----------
        qkv = jnp.dot(x, wqkv_ref[l],
                      preferred_element_type=jnp.float32) + bqkv_ref[l]

        # ---- multi-head attention; heads accumulate through wo slices -----
        wo_l = wo_ref[l]                                     # (D, D)
        attn = jnp.zeros((B * S, D), jnp.float32) + bo_ref[l]
        for h in range(NHEAD):                               # static unroll (4)
            lo = h * HEAD_DIM
            qh = qkv[:, 0 * D + lo:0 * D + lo + HEAD_DIM].reshape(B, S, HEAD_DIM)
            kh = qkv[:, 1 * D + lo:1 * D + lo + HEAD_DIM].reshape(B, S, HEAD_DIM)
            vh = qkv[:, 2 * D + lo:2 * D + lo + HEAD_DIM].reshape(B, S, HEAD_DIM)

            s = jnp.einsum('bqd,bkd->bqk', qh, kh,
                           preferred_element_type=jnp.float32) * scale
            m = jnp.max(s, axis=-1, keepdims=True)
            p = jnp.exp(s - m)
            p = p * pl.reciprocal(jnp.sum(p, axis=-1, keepdims=True), approx=True)
            oh = jnp.einsum('bqk,bkd->bqd', p, vh,
                            preferred_element_type=jnp.float32)   # (B, S, Hd)

            # fold the head directly into the output projection (no concat)
            attn = attn + jnp.dot(oh.reshape(B * S, HEAD_DIM),
                                  wo_l[lo:lo + HEAD_DIM, :],
                                  preferred_element_type=jnp.float32)

        # ---- residual + LayerNorm 1 (post-norm) ----------------------------
        y = _layer_norm(x + attn, g1_ref[l], be1_ref[l])

        # ---- feed-forward: linear2(relu(linear1(y))) ------------------------
        ff = jnp.dot(y, w1_ref[l], preferred_element_type=jnp.float32) + b1_ref[l]
        ff = jnp.maximum(ff, 0.0)
        ff = jnp.dot(ff, w2_ref[l], preferred_element_type=jnp.float32) + b2_ref[l]

        # ---- residual + LayerNorm 2 -----------------------------------------
        x = _layer_norm(y + ff, g2_ref[l], be2_ref[l])

    # ---- final linear on the last sequence position of every batch element ---
    x_last = x.reshape(B, S, D)[:, S - 1, :]                 # (B, D)
    out = jnp.sum(x_last * wout_ref[...], axis=-1, keepdims=True) + bout_ref[...]
    o_ref[...] = out.astype(o_ref.dtype)                     # (B, 1)


# ---------------------------------------------------------------------------
# Wrapper: single pallas_call, everything in VMEM (total footprint < 1 MiB).
# ---------------------------------------------------------------------------
def encoder_forward(x, p):
    B, S, D = x.shape
    assert D == D_MODEL
    x2d = x.reshape(B * S, D)                                # batch folded on sublanes

    kernel = functools.partial(fused_encoder_kernel, batch=B, seq=S)
    return pl.pallas_call(
        kernel,
        out_shape=jax.ShapeDtypeStruct((B, 1), jnp.float32),
    )(x2d,
      p["wqkv"], p["bqkv"], p["wo"], p["bo"],
      p["g1"], p["be1"],
      p["w1"], p["b1"], p["w2"], p["b2"],
      p["g2"], p["be2"],
      p["w_out"], p["b_out"])


# ---------------------------------------------------------------------------
# Deterministic parameter init (shapes follow nn.TransformerEncoderLayer/Linear),
# stacked over layers and pre-transposed so every matmul is y = x @ W + b.
# ---------------------------------------------------------------------------
def init_params(key):
    wqkv, bqkv, wo, bo = [], [], [], []
    g1, be1, w1, b1, w2, b2, g2, be2 = ([] for _ in range(8))
    for _ in range(NUM_LAYERS):
        key, *ks = jax.random.split(key, 9)
        in_proj_w = jax.random.normal(ks[0], (3 * D_MODEL, D_MODEL), jnp.float32) * 0.05
        in_proj_b = jax.random.normal(ks[1], (3 * D_MODEL,), jnp.float32) * 0.02
        wq_, wk_, wv_ = jnp.split(in_proj_w, 3, axis=0)
        wqkv.append(jnp.concatenate([wq_.T, wk_.T, wv_.T], axis=1))    # (D, 3D)
        bqkv.append(in_proj_b.reshape(1, -1))                          # (1, 3D)

        wo_w = jax.random.normal(ks[2], (D_MODEL, D_MODEL), jnp.float32) * 0.05
        bo_b = jax.random.normal(ks[3], (D_MODEL,), jnp.float32) * 0.02
        wo.append(wo_w.T)
        bo.append(bo_b.reshape(1, -1))

        w1_w = jax.random.normal(ks[4], (DIM_FF, D_MODEL), jnp.float32) * 0.05
        b1_b = jax.random.normal(ks[5], (DIM_FF,), jnp.float32) * 0.02
        w2_w = jax.random.normal(ks[6], (D_MODEL, DIM_FF), jnp.float32) * 0.05
        b2_b = jax.random.normal(ks[7], (D_MODEL,), jnp.float32) * 0.02
        w1.append(w1_w.T); b1.append(b1_b.reshape(1, -1))              # (D, F), (1, F)
        w2.append(w2_w.T); b2.append(b2_b.reshape(1, -1))              # (F, D), (1, D)

        g1.append(jnp.ones((1, D_MODEL), jnp.float32))
        be1.append(jnp.zeros((1, D_MODEL), jnp.float32))
        g2.append(jnp.ones((1, D_MODEL), jnp.float32))
        be2.append(jnp.zeros((1, D_MODEL), jnp.float32))

    key, k1, k2 = jax.random.split(key, 3)
    w_out = jax.random.normal(k1, (1, D_MODEL), jnp.float32) * 0.05    # nn.Linear(64, 1).weight
    b_out = jax.random.normal(k2, (1,), jnp.float32) * 0.02

    return dict(
        wqkv=jnp.stack(wqkv), bqkv=jnp.stack(bqkv),
        wo=jnp.stack(wo), bo=jnp.stack(bo),
        g1=jnp.stack(g1), be1=jnp.stack(be1),
        w1=jnp.stack(w1), b1=jnp.stack(b1),
        w2=jnp.stack(w2), b2=jnp.stack(b2),
        g2=jnp.stack(g2), be2=jnp.stack(be2),
        w_out=w_out,                         # kept (1, D): head done as mul+reduce
        b_out=b_out.reshape(1, 1),
    )


# ---------------------------------------------------------------------------
# Pure-JAX reference (same math) for a correctness check
# ---------------------------------------------------------------------------
def encoder_forward_ref(x, p):
    def ln(t, g, b):
        mu = t.mean(-1, keepdims=True)
        var = ((t - mu) ** 2).mean(-1, keepdims=True)
        return (t - mu) / jnp.sqrt(var + LN_EPS) * g + b

    B, S, D = x.shape
    for l in range(NUM_LAYERS):
        qkv = x @ p["wqkv"][l] + p["bqkv"][l]
        q, k, v = qkv[..., :D], qkv[..., D:2 * D], qkv[..., 2 * D:]
        qh = q.reshape(B, S, NHEAD, HEAD_DIM)
        kh = k.reshape(B, S, NHEAD, HEAD_DIM)
        vh = v.reshape(B, S, NHEAD, HEAD_DIM)
        s = jnp.einsum("bqhd,bkhd->bhqk", qh, kh) / jnp.sqrt(float(HEAD_DIM))
        a = jax.nn.softmax(s, axis=-1)
        o = jnp.einsum("bhqk,bkhd->bqhd", a, vh).reshape(B, S, D)
        o = o @ p["wo"][l] + p["bo"][l]
        y = ln(x + o, p["g1"][l], p["be1"][l])
        ff = jax.nn.relu(y @ p["w1"][l] + p["b1"][l]) @ p["w2"][l] + p["b2"][l]
        x = ln(y + ff, p["g2"][l], p["be2"][l])
    return x[:, -1, :] @ p["w_out"].T + p["b_out"]


# ---------------------------------------------------------------------------
if __name__ == "__main__":
    B, S = 2, 8  # batch=2, seq=8, d_model=64 (src is (B, S, d_model) pre-permute)
    key = jax.random.PRNGKey(0)
    k_x, k_p = jax.random.split(key)
    x = jax.random.normal(k_x, (B, S, D_MODEL), dtype=jnp.float32)
    params = init_params(k_p)

    out = encoder_forward(x, params)
    out = jax.block_until_ready(out)
    assert out.shape == (B, 1), out.shape

    ref = encoder_forward_ref(x, params)
    # pl.reciprocal(approx=True) in the softmax -> slightly looser tolerance.
    assert jnp.allclose(out, ref, atol=1e-3, rtol=1e-3), (out, ref)

    print("KERNEL_OK")
</pallas_src>

<mosaic_0001>
module attributes {stable_mosaic.version = 11 : i64} {
  func.func @fused_encoder_kernel(%arg0: memref<16x64xf32, #tpu.memory_space<vmem>>, %arg1: memref<2x64x192xf32, #tpu.memory_space<vmem>>, %arg2: memref<2x1x192xf32, #tpu.memory_space<vmem>>, %arg3: memref<2x64x64xf32, #tpu.memory_space<vmem>>, %arg4: memref<2x1x64xf32, #tpu.memory_space<vmem>>, %arg5: memref<2x1x64xf32, #tpu.memory_space<vmem>>, %arg6: memref<2x1x64xf32, #tpu.memory_space<vmem>>, %arg7: memref<2x64x256xf32, #tpu.memory_space<vmem>>, %arg8: memref<2x1x256xf32, #tpu.memory_space<vmem>>, %arg9: memref<2x256x64xf32, #tpu.memory_space<vmem>>, %arg10: memref<2x1x64xf32, #tpu.memory_space<vmem>>, %arg11: memref<2x1x64xf32, #tpu.memory_space<vmem>>, %arg12: memref<2x1x64xf32, #tpu.memory_space<vmem>>, %arg13: memref<1x64xf32, #tpu.memory_space<vmem>>, %arg14: memref<1x1xf32, #tpu.memory_space<vmem>>, %arg15: memref<2x1xf32, #tpu.memory_space<vmem>>) attributes {dimension_semantics = [], scalar_prefetch = 0 : i64, scratch_operands = 0 : i64, tpu.core_type = #tpu.core_type<tc>} {
    %c0 = arith.constant 0 : index
    %c0_0 = arith.constant 0 : index
    %0 = vector.load %arg0[%c0, %c0_0] : memref<16x64xf32, #tpu.memory_space<vmem>>, vector<16x64xf32>
    %c0_1 = arith.constant 0 : index
    %c0_2 = arith.constant 0 : index
    %c0_3 = arith.constant 0 : index
    %1 = vector.load %arg1[%c0_1, %c0_2, %c0_3] : memref<2x64x192xf32, #tpu.memory_space<vmem>>, vector<1x64x192xf32>
    %2 = vector.shape_cast %1 : vector<1x64x192xf32> to vector<64x192xf32>
    %cst = arith.constant dense<0.000000e+00> : vector<16x192xf32>
    %3 = tpu.matmul %0, %2, %cst {dimension_numbers = #tpu.dot_dimension_numbers<[1], [0], [0], [1], [0, 0, 1, 1], [], []>} : vector<16x64xf32>, vector<64x192xf32>, vector<16x192xf32> -> vector<16x192xf32>
    %c0_4 = arith.constant 0 : index
    %c0_5 = arith.constant 0 : index
    %c0_6 = arith.constant 0 : index
    %4 = vector.load %arg2[%c0_4, %c0_5, %c0_6] : memref<2x1x192xf32, #tpu.memory_space<vmem>>, vector<1x1x192xf32>
    %5 = vector.shape_cast %4 : vector<1x1x192xf32> to vector<1x192xf32>
    %6 = vector.broadcast %5 : vector<1x192xf32> to vector<16x192xf32>
    %7 = arith.addf %3, %6 : vector<16x192xf32>
    %c0_7 = arith.constant 0 : index
    %c0_8 = arith.constant 0 : index
    %c0_9 = arith.constant 0 : index
    %8 = vector.load %arg3[%c0_7, %c0_8, %c0_9] : memref<2x64x64xf32, #tpu.memory_space<vmem>>, vector<1x64x64xf32>
    %9 = vector.shape_cast %8 : vector<1x64x64xf32> to vector<64x64xf32>
    %cst_10 = arith.constant 0.000000e+00 : f32
    %10 = vector.broadcast %cst_10 : f32 to vector<16x64xf32>
    %c0_11 = arith.constant 0 : index
    %c0_12 = arith.constant 0 : index
    %c0_13 = arith.constant 0 : index
    %11 = vector.load %arg4[%c0_11, %c0_12, %c0_13] : memref<2x1x64xf32, #tpu.memory_space<vmem>>, vector<1x1x64xf32>
    %12 = vector.shape_cast %11 : vector<1x1x64xf32> to vector<1x64xf32>
    %13 = vector.broadcast %12 : vector<1x64xf32> to vector<16x64xf32>
    %14 = arith.addf %10, %13 : vector<16x64xf32>
    %15 = vector.extract_strided_slice %7 {offsets = [0, 0], sizes = [16, 16], strides = [1, 1]} : vector<16x192xf32> to vector<16x16xf32>
    %16 = vector.shape_cast %15 : vector<16x16xf32> to vector<2x8x16xf32>
    %17 = vector.extract_strided_slice %7 {offsets = [0, 64], sizes = [16, 16], strides = [1, 1]} : vector<16x192xf32> to vector<16x16xf32>
    %18 = vector.shape_cast %17 : vector<16x16xf32> to vector<2x8x16xf32>
    %19 = vector.extract_strided_slice %7 {offsets = [0, 128], sizes = [16, 16], strides = [1, 1]} : vector<16x192xf32> to vector<16x16xf32>
    %20 = vector.shape_cast %19 : vector<16x16xf32> to vector<2x8x16xf32>
    "tpu.trace_start"() <{level = 10 : i32, message = "bqd,bkd->bqk"}> : () -> ()
    %cst_14 = arith.constant dense<0.000000e+00> : vector<2x8x8xf32>
    %21 = tpu.matmul %16, %18, %cst_14 {dimension_numbers = #tpu.dot_dimension_numbers<[2], [2], [1], [1], [0, 0, 0, 1, 1, 1], [0], [0]>} : vector<2x8x16xf32>, vector<2x8x16xf32>, vector<2x8x8xf32> -> vector<2x8x8xf32>
    "tpu.trace_stop"() : () -> ()
    %cst_15 = arith.constant 2.500000e-01 : f32
    %22 = vector.broadcast %cst_15 : f32 to vector<2x8x8xf32>
    %23 = arith.mulf %21, %22 : vector<2x8x8xf32>
    %cst_16 = arith.constant dense<0xFF800000> : vector<2x8xf32>
    %24 = vector.multi_reduction <maximumf>, %23, %cst_16 [2] : vector<2x8x8xf32> to vector<2x8xf32>
    %25 = vector.shape_cast %24 : vector<2x8xf32> to vector<2x8x1xf32>
    %26 = vector.broadcast %25 : vector<2x8x1xf32> to vector<2x8x8xf32>
    %27 = arith.subf %23, %26 : vector<2x8x8xf32>
    %28 = math.exp %27 : vector<2x8x8xf32>
    %cst_17 = arith.constant dense<0.000000e+00> : vector<2x8xf32>
    %29 = vector.multi_reduction <add>, %28, %cst_17 [2] : vector<2x8x8xf32> to vector<2x8xf32>
    %30 = vector.shape_cast %29 : vector<2x8xf32> to vector<2x8x1xf32>
    %31 = tpu.reciprocal %30 {approx = true} : vector<2x8x1xf32> -> vector<2x8x1xf32>
    %32 = vector.broadcast %31 : vector<2x8x1xf32> to vector<2x8x8xf32>
    %33 = arith.mulf %28, %32 : vector<2x8x8xf32>
    "tpu.trace_start"() <{level = 10 : i32, message = "bqk,bkd->bqd"}> : () -> ()
    %cst_18 = arith.constant dense<0.000000e+00> : vector<2x8x16xf32>
    %34 = tpu.matmul %33, %20, %cst_18 {dimension_numbers = #tpu.dot_dimension_numbers<[2], [1], [1], [2], [0, 0, 0, 1, 1, 2], [0], [0]>} : vector<2x8x8xf32>, vector<2x8x16xf32>, vector<2x8x16xf32> -> vector<2x8x16xf32>
    "tpu.trace_stop"() : () -> ()
    %35 = vector.shape_cast %34 : vector<2x8x16xf32> to vector<16x16xf32>
    %36 = vector.extract_strided_slice %9 {offsets = [0, 0], sizes = [16, 64], strides = [1, 1]} : vector<64x64xf32> to vector<16x64xf32>
    %cst_19 = arith.constant dense<0.000000e+00> : vector<16x64xf32>
    %37 = tpu.matmul %35, %36, %cst_19 {dimension_numbers = #tpu.dot_dimension_numbers<[1], [0], [0], [1], [0, 0, 1, 1], [], []>} : vector<16x16xf32>, vector<16x64xf32>, vector<16x64xf32> -> vector<16x64xf32>
    %38 = arith.addf %14, %37 : vector<16x64xf32>
    %39 = vector.extract_strided_slice %7 {offsets = [0, 16], sizes = [16, 16], strides = [1, 1]} : vector<16x192xf32> to vector<16x16xf32>
    %40 = vector.shape_cast %39 : vector<16x16xf32> to vector<2x8x16xf32>
    %41 = vector.extract_strided_slice %7 {offsets = [0, 80], sizes = [16, 16], strides = [1, 1]} : vector<16x192xf32> to vector<16x16xf32>
    %42 = vector.shape_cast %41 : vector<16x16xf32> to vector<2x8x16xf32>
    %43 = vector.extract_strided_slice %7 {offsets = [0, 144], sizes = [16, 16], strides = [1, 1]} : vector<16x192xf32> to vector<16x16xf32>
    %44 = vector.shape_cast %43 : vector<16x16xf32> to vector<2x8x16xf32>
    "tpu.trace_start"() <{level = 10 : i32, message = "bqd,bkd->bqk"}> : () -> ()
    %cst_20 = arith.constant dense<0.000000e+00> : vector<2x8x8xf32>
    %45 = tpu.matmul %40, %42, %cst_20 {dimension_numbers = #tpu.dot_dimension_numbers<[2], [2], [1], [1], [0, 0, 0, 1, 1, 1], [0], [0]>} : vector<2x8x16xf32>, vector<2x8x16xf32>, vector<2x8x8xf32> -> vector<2x8x8xf32>
    "tpu.trace_stop"() : () -> ()
    %cst_21 = arith.constant 2.500000e-01 : f32
    %46 = vector.broadcast %cst_21 : f32 to vector<2x8x8xf32>
    %47 = arith.mulf %45, %46 : vector<2x8x8xf32>
    %cst_22 = arith.constant dense<0xFF800000> : vector<2x8xf32>
    %48 = vector.multi_reduction <maximumf>, %47, %cst_22 [2] : vector<2x8x8xf32> to vector<2x8xf32>
    %49 = vector.shape_cast %48 : vector<2x8xf32> to vector<2x8x1xf32>
    %50 = vector.broadcast %49 : vector<2x8x1xf32> to vector<2x8x8xf32>
    %51 = arith.subf %47, %50 : vector<2x8x8xf32>
    %52 = math.exp %51 : vector<2x8x8xf32>
    %cst_23 = arith.constant dense<0.000000e+00> : vector<2x8xf32>
    %53 = vector.multi_reduction <add>, %52, %cst_23 [2] : vector<2x8x8xf32> to vector<2x8xf32>
    %54 = vector.shape_cast %53 : vector<2x8xf32> to vector<2x8x1xf32>
    %55 = tpu.reciprocal %54 {approx = true} : vector<2x8x1xf32> -> vector<2x8x1xf32>
    %56 = vector.broadcast %55 : vector<2x8x1xf32> to vector<2x8x8xf32>
    %57 = arith.mulf %52, %56 : vector<2x8x8xf32>
    "tpu.trace_start"() <{level = 10 : i32, message = "bqk,bkd->bqd"}> : () -> ()
    %cst_24 = arith.constant dense<0.000000e+00> : vector<2x8x16xf32>
    %58 = tpu.matmul %57, %44, %cst_24 {dimension_numbers = #tpu.dot_dimension_numbers<[2], [1], [1], [2], [0, 0, 0, 1, 1, 2], [0], [0]>} : vector<2x8x8xf32>, vector<2x8x16xf32>, vector<2x8x16xf32> -> vector<2x8x16xf32>
    "tpu.trace_stop"() : () -> ()
    %59 = vector.shape_cast %58 : vector<2x8x16xf32> to vector<16x16xf32>
    %60 = vector.extract_strided_slice %9 {offsets = [16, 0], sizes = [16, 64], strides = [1, 1]} : vector<64x64xf32> to vector<16x64xf32>
    %cst_25 = arith.constant dense<0.000000e+00> : vector<16x64xf32>
    %61 = tpu.matmul %59, %60, %cst_25 {dimension_numbers = #tpu.dot_dimension_numbers<[1], [0], [0], [1], [0, 0, 1, 1], [], []>} : vector<16x16xf32>, vector<16x64xf32>, vector<16x64xf32> -> vector<16x64xf32>
    %62 = arith.addf %38, %61 : vector<16x64xf32>
    %63 = vector.extract_strided_slice %7 {offsets = [0, 32], sizes = [16, 16], strides = [1, 1]} : vector<16x192xf32> to vector<16x16xf32>
    %64 = vector.shape_cast %63 : vector<16x16xf32> to vector<2x8x16xf32>
    %65 = vector.extract_strided_slice %7 {offsets = [0, 96], sizes = [16, 16], strides = [1, 1]} : vector<16x192xf32> to vector<16x16xf32>
    %66 = vector.shape_cast %65 : vector<16x16xf32> to vector<2x8x16xf32>
    %67 = vector.extract_strided_slice %7 {offsets = [0, 160], sizes = [16, 16], strides = [1, 1]} : vector<16x192xf32> to vector<16x16xf32>
    %68 = vector.shape_cast %67 : vector<16x16xf32> to vector<2x8x16xf32>
    "tpu.trace_start"() <{level = 10 : i32, message = "bqd,bkd->bqk"}> : () -> ()
    %cst_26 = arith.constant dense<0.000000e+00> : vector<2x8x8xf32>
    %69 = tpu.matmul %64, %66, %cst_26 {dimension_numbers = #tpu.dot_dimension_numbers<[2], [2], [1], [1], [0, 0, 0, 1, 1, 1], [0], [0]>} : vector<2x8x16xf32>, vector<2x8x16xf32>, vector<2x8x8xf32> -> vector<2x8x8xf32>
    "tpu.trace_stop"() : () -> ()
    %cst_27 = arith.constant 2.500000e-01 : f32
    %70 = vector.broadcast %cst_27 : f32 to vector<2x8x8xf32>
    %71 = arith.mulf %69, %70 : vector<2x8x8xf32>
    %cst_28 = arith.constant dense<0xFF800000> : vector<2x8xf32>
    %72 = vector.multi_reduction <maximumf>, %71, %cst_28 [2] : vector<2x8x8xf32> to vector<2x8xf32>
    %73 = vector.shape_cast %72 : vector<2x8xf32> to vector<2x8x1xf32>
    %74 = vector.broadcast %73 : vector<2x8x1xf32> to vector<2x8x8xf32>
    %75 = arith.subf %71, %74 : vector<2x8x8xf32>
    %76 = math.exp %75 : vector<2x8x8xf32>
    %cst_29 = arith.constant dense<0.000000e+00> : vector<2x8xf32>
    %77 = vector.multi_reduction <add>, %76, %cst_29 [2] : vector<2x8x8xf32> to vector<2x8xf32>
    %78 = vector.shape_cast %77 : vector<2x8xf32> to vector<2x8x1xf32>
    %79 = tpu.reciprocal %78 {approx = true} : vector<2x8x1xf32> -> vector<2x8x1xf32>
    %80 = vector.broadcast %79 : vector<2x8x1xf32> to vector<2x8x8xf32>
    %81 = arith.mulf %76, %80 : vector<2x8x8xf32>
    "tpu.trace_start"() <{level = 10 : i32, message = "bqk,bkd->bqd"}> : () -> ()
    %cst_30 = arith.constant dense<0.000000e+00> : vector<2x8x16xf32>
    %82 = tpu.matmul %81, %68, %cst_30 {dimension_numbers = #tpu.dot_dimension_numbers<[2], [1], [1], [2], [0, 0, 0, 1, 1, 2], [0], [0]>} : vector<2x8x8xf32>, vector<2x8x16xf32>, vector<2x8x16xf32> -> vector<2x8x16xf32>
    "tpu.trace_stop"() : () -> ()
    %83 = vector.shape_cast %82 : vector<2x8x16xf32> to vector<16x16xf32>
    %84 = vector.extract_strided_slice %9 {offsets = [32, 0], sizes = [16, 64], strides = [1, 1]} : vector<64x64xf32> to vector<16x64xf32>
    %cst_31 = arith.constant dense<0.000000e+00> : vector<16x64xf32>
    %85 = tpu.matmul %83, %84, %cst_31 {dimension_numbers = #tpu.dot_dimension_numbers<[1], [0], [0], [1], [0, 0, 1, 1], [], []>} : vector<16x16xf32>, vector<16x64xf32>, vector<16x64xf32> -> vector<16x64xf32>
    %86 = arith.addf %62, %85 : vector<16x64xf32>
    %87 = vector.extract_strided_slice %7 {offsets = [0, 48], sizes = [16, 16], strides = [1, 1]} : vector<16x192xf32> to vector<16x16xf32>
    %88 = vector.shape_cast %87 : vector<16x16xf32> to vector<2x8x16xf32>
    %89 = vector.extract_strided_slice %7 {offsets = [0, 112], sizes = [16, 16], strides = [1, 1]} : vector<16x192xf32> to vector<16x16xf32>
    %90 = vector.shape_cast %89 : vector<16x16xf32> to vector<2x8x16xf32>
    %91 = vector.extract_strided_slice %7 {offsets = [0, 176], sizes = [16, 16], strides = [1, 1]} : vector<16x192xf32> to vector<16x16xf32>
    %92 = vector.shape_cast %91 : vector<16x16xf32> to vector<2x8x16xf32>
    "tpu.trace_start"() <{level = 10 : i32, message = "bqd,bkd->bqk"}> : () -> ()
    %cst_32 = arith.constant dense<0.000000e+00> : vector<2x8x8xf32>
    %93 = tpu.matmul %88, %90, %cst_32 {dimension_numbers = #tpu.dot_dimension_numbers<[2], [2], [1], [1], [0, 0, 0, 1, 1, 1], [0], [0]>} : vector<2x8x16xf32>, vector<2x8x16xf32>, vector<2x8x8xf32> -> vector<2x8x8xf32>
    "tpu.trace_stop"() : () -> ()
    %cst_33 = arith.constant 2.500000e-01 : f32
    %94 = vector.broadcast %cst_33 : f32 to vector<2x8x8xf32>
    %95 = arith.mulf %93, %94 : vector<2x8x8xf32>
    %cst_34 = arith.constant dense<0xFF800000> : vector<2x8xf32>
    %96 = vector.multi_reduction <maximumf>, %95, %cst_34 [2] : vector<2x8x8xf32> to vector<2x8xf32>
    %97 = vector.shape_cast %96 : vector<2x8xf32> to vector<2x8x1xf32>
    %98 = vector.broadcast %97 : vector<2x8x1xf32> to vector<2x8x8xf32>
    %99 = arith.subf %95, %98 : vector<2x8x8xf32>
    %100 = math.exp %99 : vector<2x8x8xf32>
    %cst_35 = arith.constant dense<0.000000e+00> : vector<2x8xf32>
    %101 = vector.multi_reduction <add>, %100, %cst_35 [2] : vector<2x8x8xf32> to vector<2x8xf32>
    %102 = vector.shape_cast %101 : vector<2x8xf32> to vector<2x8x1xf32>
    %103 = tpu.reciprocal %102 {approx = true} : vector<2x8x1xf32> -> vector<2x8x1xf32>
    %104 = vector.broadcast %103 : vector<2x8x1xf32> to vector<2x8x8xf32>
    %105 = arith.mulf %100, %104 : vector<2x8x8xf32>
    "tpu.trace_start"() <{level = 10 : i32, message = "bqk,bkd->bqd"}> : () -> ()
    %cst_36 = arith.constant dense<0.000000e+00> : vector<2x8x16xf32>
    %106 = tpu.matmul %105, %92, %cst_36 {dimension_numbers = #tpu.dot_dimension_numbers<[2], [1], [1], [2], [0, 0, 0, 1, 1, 2], [0], [0]>} : vector<2x8x8xf32>, vector<2x8x16xf32>, vector<2x8x16xf32> -> vector<2x8x16xf32>
    "tpu.trace_stop"() : () -> ()
    %107 = vector.shape_cast %106 : vector<2x8x16xf32> to vector<16x16xf32>
    %108 = vector.extract_strided_slice %9 {offsets = [48, 0], sizes = [16, 64], strides = [1, 1]} : vector<64x64xf32> to vector<16x64xf32>
    %cst_37 = arith.constant dense<0.000000e+00> : vector<16x64xf32>
    %109 = tpu.matmul %107, %108, %cst_37 {dimension_numbers = #tpu.dot_dimension_numbers<[1], [0], [0], [1], [0, 0, 1, 1], [], []>} : vector<16x16xf32>, vector<16x64xf32>, vector<16x64xf32> -> vector<16x64xf32>
    %110 = arith.addf %86, %109 : vector<16x64xf32>
    %111 = arith.addf %0, %110 : vector<16x64xf32>
    %c0_38 = arith.constant 0 : index
    %c0_39 = arith.constant 0 : index
    %c0_40 = arith.constant 0 : index
    %112 = vector.load %arg5[%c0_38, %c0_39, %c0_40] : memref<2x1x64xf32, #tpu.memory_space<vmem>>, vector<1x1x64xf32>
    %113 = vector.shape_cast %112 : vector<1x1x64xf32> to vector<1x64xf32>
    %c0_41 = arith.constant 0 : index
    %c0_42 = arith.constant 0 : index
    %c0_43 = arith.constant 0 : index
    %114 = vector.load %arg6[%c0_41, %c0_42, %c0_43] : memref<2x1x64xf32, #tpu.memory_space<vmem>>, vector<1x1x64xf32>
    %115 = vector.shape_cast %114 : vector<1x1x64xf32> to vector<1x64xf32>
    %cst_44 = arith.constant dense<0.000000e+00> : vector<16xf32>
    %116 = vector.multi_reduction <add>, %111, %cst_44 [1] : vector<16x64xf32> to vector<16xf32>
    %117 = vector.shape_cast %116 : vector<16xf32> to vector<16x1xf32>
    %cst_45 = arith.constant 6.400000e+01 : f32
    %118 = vector.broadcast %cst_45 : f32 to vector<16x1xf32>
    %119 = arith.divf %117, %118 : vector<16x1xf32>
    %120 = vector.broadcast %119 : vector<16x1xf32> to vector<16x64xf32>
    %121 = arith.subf %111, %120 : vector<16x64xf32>
    %122 = arith.mulf %121, %121 : vector<16x64xf32>
    %cst_46 = arith.constant dense<0.000000e+00> : vector<16xf32>
    %123 = vector.multi_reduction <add>, %122, %cst_46 [1] : vector<16x64xf32> to vector<16xf32>
    %124 = vector.shape_cast %123 : vector<16xf32> to vector<16x1xf32>
    %cst_47 = arith.constant 6.400000e+01 : f32
    %125 = vector.broadcast %cst_47 : f32 to vector<16x1xf32>
    %126 = arith.divf %124, %125 : vector<16x1xf32>
    %127 = vector.broadcast %119 : vector<16x1xf32> to vector<16x64xf32>
    %128 = arith.subf %111, %127 : vector<16x64xf32>
    %cst_48 = arith.constant 9.99999974E-6 : f32
    %129 = vector.broadcast %cst_48 : f32 to vector<16x1xf32>
    %130 = arith.addf %126, %129 : vector<16x1xf32>
    %131 = math.rsqrt %130 : vector<16x1xf32>
    %132 = vector.broadcast %131 : vector<16x1xf32> to vector<16x64xf32>
    %133 = arith.mulf %128, %132 : vector<16x64xf32>
    %134 = vector.broadcast %113 : vector<1x64xf32> to vector<16x64xf32>
    %135 = arith.mulf %133, %134 : vector<16x64xf32>
    %136 = vector.broadcast %115 : vector<1x64xf32> to vector<16x64xf32>
    %137 = arith.addf %135, %136 : vector<16x64xf32>
    %c0_49 = arith.constant 0 : index
    %c0_50 = arith.constant 0 : index
    %c0_51 = arith.constant 0 : index
    %138 = vector.load %arg7[%c0_49, %c0_50, %c0_51] : memref<2x64x256xf32, #tpu.memory_space<vmem>>, vector<1x64x256xf32>
    %139 = vector.shape_cast %138 : vector<1x64x256xf32> to vector<64x256xf32>
    %cst_52 = arith.constant dense<0.000000e+00> : vector<16x256xf32>
    %140 = tpu.matmul %137, %139, %cst_52 {dimension_numbers = #tpu.dot_dimension_numbers<[1], [0], [0], [1], [0, 0, 1, 1], [], []>} : vector<16x64xf32>, vector<64x256xf32>, vector<16x256xf32> -> vector<16x256xf32>
    %c0_53 = arith.constant 0 : index
    %c0_54 = arith.constant 0 : index
    %c0_55 = arith.constant 0 : index
    %141 = vector.load %arg8[%c0_53, %c0_54, %c0_55] : memref<2x1x256xf32, #tpu.memory_space<vmem>>, vector<1x1x256xf32>
    %142 = vector.shape_cast %141 : vector<1x1x256xf32> to vector<1x256xf32>
    %143 = vector.broadcast %142 : vector<1x256xf32> to vector<16x256xf32>
    %144 = arith.addf %140, %143 : vector<16x256xf32>
    %cst_56 = arith.constant 0.000000e+00 : f32
    %145 = vector.broadcast %cst_56 : f32 to vector<16x256xf32>
    %146 = arith.maximumf %144, %145 : vector<16x256xf32>
    %c0_57 = arith.constant 0 : index
    %c0_58 = arith.constant 0 : index
    %c0_59 = arith.constant 0 : index
    %147 = vector.load %arg9[%c0_57, %c0_58, %c0_59] : memref<2x256x64xf32, #tpu.memory_space<vmem>>, vector<1x256x64xf32>
    %148 = vector.shape_cast %147 : vector<1x256x64xf32> to vector<256x64xf32>
    %cst_60 = arith.constant dense<0.000000e+00> : vector<16x64xf32>
    %149 = tpu.matmul %146, %148, %cst_60 {dimension_numbers = #tpu.dot_dimension_numbers<[1], [0], [0], [1], [0, 0, 1, 1], [], []>} : vector<16x256xf32>, vector<256x64xf32>, vector<16x64xf32> -> vector<16x64xf32>
    %c0_61 = arith.constant 0 : index
    %c0_62 = arith.constant 0 : index
    %c0_63 = arith.constant 0 : index
    %150 = vector.load %arg10[%c0_61, %c0_62, %c0_63] : memref<2x1x64xf32, #tpu.memory_space<vmem>>, vector<1x1x64xf32>
    %151 = vector.shape_cast %150 : vector<1x1x64xf32> to vector<1x64xf32>
    %152 = vector.broadcast %151 : vector<1x64xf32> to vector<16x64xf32>
    %153 = arith.addf %149, %152 : vector<16x64xf32>
    %154 = arith.addf %137, %153 : vector<16x64xf32>
    %c0_64 = arith.constant 0 : index
    %c0_65 = arith.constant 0 : index
    %c0_66 = arith.constant 0 : index
    %155 = vector.load %arg11[%c0_64, %c0_65, %c0_66] : memref<2x1x64xf32, #tpu.memory_space<vmem>>, vector<1x1x64xf32>
    %156 = vector.shape_cast %155 : vector<1x1x64xf32> to vector<1x64xf32>
    %c0_67 = arith.constant 0 : index
    %c0_68 = arith.constant 0 : index
    %c0_69 = arith.constant 0 : index
    %157 = vector.load %arg12[%c0_67, %c0_68, %c0_69] : memref<2x1x64xf32, #tpu.memory_space<vmem>>, vector<1x1x64xf32>
    %158 = vector.shape_cast %157 : vector<1x1x64xf32> to vector<1x64xf32>
    %cst_70 = arith.constant dense<0.000000e+00> : vector<16xf32>
    %159 = vector.multi_reduction <add>, %154, %cst_70 [1] : vector<16x64xf32> to vector<16xf32>
    %160 = vector.shape_cast %159 : vector<16xf32> to vector<16x1xf32>
    %cst_71 = arith.constant 6.400000e+01 : f32
    %161 = vector.broadcast %cst_71 : f32 to vector<16x1xf32>
    %162 = arith.divf %160, %161 : vector<16x1xf32>
    %163 = vector.broadcast %162 : vector<16x1xf32> to vector<16x64xf32>
    %164 = arith.subf %154, %163 : vector<16x64xf32>
    %165 = arith.mulf %164, %164 : vector<16x64xf32>
    %cst_72 = arith.constant dense<0.000000e+00> : vector<16xf32>
    %166 = vector.multi_reduction <add>, %165, %cst_72 [1] : vector<16x64xf32> to vector<16xf32>
    %167 = vector.shape_cast %166 : vector<16xf32> to vector<16x1xf32>
    %cst_73 = arith.constant 6.400000e+01 : f32
    %168 = vector.broadcast %cst_73 : f32 to vector<16x1xf32>
    %169 = arith.divf %167, %168 : vector<16x1xf32>
    %170 = vector.broadcast %162 : vector<16x1xf32> to vector<16x64xf32>
    %171 = arith.subf %154, %170 : vector<16x64xf32>
    %cst_74 = arith.constant 9.99999974E-6 : f32
    %172 = vector.broadcast %cst_74 : f32 to vector<16x1xf32>
    %173 = arith.addf %169, %172 : vector<16x1xf32>
    %174 = math.rsqrt %173 : vector<16x1xf32>
    %175 = vector.broadcast %174 : vector<16x1xf32> to vector<16x64xf32>
    %176 = arith.mulf %171, %175 : vector<16x64xf32>
    %177 = vector.broadcast %156 : vector<1x64xf32> to vector<16x64xf32>
    %178 = arith.mulf %176, %177 : vector<16x64xf32>
    %179 = vector.broadcast %158 : vector<1x64xf32> to vector<16x64xf32>
    %180 = arith.addf %178, %179 : vector<16x64xf32>
    %c1 = arith.constant 1 : index
    %c0_75 = arith.constant 0 : index
    %c0_76 = arith.constant 0 : index
    %181 = vector.load %arg1[%c1, %c0_75, %c0_76] : memref<2x64x192xf32, #tpu.memory_space<vmem>>, vector<1x64x192xf32>
    %182 = vector.shape_cast %181 : vector<1x64x192xf32> to vector<64x192xf32>
    %cst_77 = arith.constant dense<0.000000e+00> : vector<16x192xf32>
    %183 = tpu.matmul %180, %182, %cst_77 {dimension_numbers = #tpu.dot_dimension_numbers<[1], [0], [0], [1], [0, 0, 1, 1], [], []>} : vector<16x64xf32>, vector<64x192xf32>, vector<16x192xf32> -> vector<16x192xf32>
    %c1_78 = arith.constant 1 : index
    %c0_79 = arith.constant 0 : index
    %c0_80 = arith.constant 0 : index
    %184 = vector.load %arg2[%c1_78, %c0_79, %c0_80] : memref<2x1x192xf32, #tpu.memory_space<vmem>>, vector<1x1x192xf32>
    %185 = vector.shape_cast %184 : vector<1x1x192xf32> to vector<1x192xf32>
    %186 = vector.broadcast %185 : vector<1x192xf32> to vector<16x192xf32>
    %187 = arith.addf %183, %186 : vector<16x192xf32>
    %c1_81 = arith.constant 1 : index
    %c0_82 = arith.constant 0 : index
    %c0_83 = arith.constant 0 : index
    %188 = vector.load %arg3[%c1_81, %c0_82, %c0_83] : memref<2x64x64xf32, #tpu.memory_space<vmem>>, vector<1x64x64xf32>
    %189 = vector.shape_cast %188 : vector<1x64x64xf32> to vector<64x64xf32>
    %cst_84 = arith.constant 0.000000e+00 : f32
    %190 = vector.broadcast %cst_84 : f32 to vector<16x64xf32>
    %c1_85 = arith.constant 1 : index
    %c0_86 = arith.constant 0 : index
    %c0_87 = arith.constant 0 : index
    %191 = vector.load %arg4[%c1_85, %c0_86, %c0_87] : memref<2x1x64xf32, #tpu.memory_space<vmem>>, vector<1x1x64xf32>
    %192 = vector.shape_cast %191 : vector<1x1x64xf32> to vector<1x64xf32>
    %193 = vector.broadcast %192 : vector<1x64xf32> to vector<16x64xf32>
    %194 = arith.addf %190, %193 : vector<16x64xf32>
    %195 = vector.extract_strided_slice %187 {offsets = [0, 0], sizes = [16, 16], strides = [1, 1]} : vector<16x192xf32> to vector<16x16xf32>
    %196 = vector.shape_cast %195 : vector<16x16xf32> to vector<2x8x16xf32>
    %197 = vector.extract_strided_slice %187 {offsets = [0, 64], sizes = [16, 16], strides = [1, 1]} : vector<16x192xf32> to vector<16x16xf32>
    %198 = vector.shape_cast %197 : vector<16x16xf32> to vector<2x8x16xf32>
    %199 = vector.extract_strided_slice %187 {offsets = [0, 128], sizes = [16, 16], strides = [1, 1]} : vector<16x192xf32> to vector<16x16xf32>
    %200 = vector.shape_cast %199 : vector<16x16xf32> to vector<2x8x16xf32>
    "tpu.trace_start"() <{level = 10 : i32, message = "bqd,bkd->bqk"}> : () -> ()
    %cst_88 = arith.constant dense<0.000000e+00> : vector<2x8x8xf32>
    %201 = tpu.matmul %196, %198, %cst_88 {dimension_numbers = #tpu.dot_dimension_numbers<[2], [2], [1], [1], [0, 0, 0, 1, 1, 1], [0], [0]>} : vector<2x8x16xf32>, vector<2x8x16xf32>, vector<2x8x8xf32> -> vector<2x8x8xf32>
    "tpu.trace_stop"() : () -> ()
    %cst_89 = arith.constant 2.500000e-01 : f32
    %202 = vector.broadcast %cst_89 : f32 to vector<2x8x8xf32>
    %203 = arith.mulf %201, %202 : vector<2x8x8xf32>
    %cst_90 = arith.constant dense<0xFF800000> : vector<2x8xf32>
    %204 = vector.multi_reduction <maximumf>, %203, %cst_90 [2] : vector<2x8x8xf32> to vector<2x8xf32>
    %205 = vector.shape_cast %204 : vector<2x8xf32> to vector<2x8x1xf32>
    %206 = vector.broadcast %205 : vector<2x8x1xf32> to vector<2x8x8xf32>
    %207 = arith.subf %203, %206 : vector<2x8x8xf32>
    %208 = math.exp %207 : vector<2x8x8xf32>
    %cst_91 = arith.constant dense<0.000000e+00> : vector<2x8xf32>
    %209 = vector.multi_reduction <add>, %208, %cst_91 [2] : vector<2x8x8xf32> to vector<2x8xf32>
    %210 = vector.shape_cast %209 : vector<2x8xf32> to vector<2x8x1xf32>
    %211 = tpu.reciprocal %210 {approx = true} : vector<2x8x1xf32> -> vector<2x8x1xf32>
    %212 = vector.broadcast %211 : vector<2x8x1xf32> to vector<2x8x8xf32>
    %213 = arith.mulf %208, %212 : vector<2x8x8xf32>
    "tpu.trace_start"() <{level = 10 : i32, message = "bqk,bkd->bqd"}> : () -> ()
    %cst_92 = arith.constant dense<0.000000e+00> : vector<2x8x16xf32>
    %214 = tpu.matmul %213, %200, %cst_92 {dimension_numbers = #tpu.dot_dimension_numbers<[2], [1], [1], [2], [0, 0, 0, 1, 1, 2], [0], [0]>} : vector<2x8x8xf32>, vector<2x8x16xf32>, vector<2x8x16xf32> -> vector<2x8x16xf32>
    "tpu.trace_stop"() : () -> ()
    %215 = vector.shape_cast %214 : vector<2x8x16xf32> to vector<16x16xf32>
    %216 = vector.extract_strided_slice %189 {offsets = [0, 0], sizes = [16, 64], strides = [1, 1]} : vector<64x64xf32> to vector<16x64xf32>
    %cst_93 = arith.constant dense<0.000000e+00> : vector<16x64xf32>
    %217 = tpu.matmul %215, %216, %cst_93 {dimension_numbers = #tpu.dot_dimension_numbers<[1], [0], [0], [1], [0, 0, 1, 1], [], []>} : vector<16x16xf32>, vector<16x64xf32>, vector<16x64xf32> -> vector<16x64xf32>
    %218 = arith.addf %194, %217 : vector<16x64xf32>
    %219 = vector.extract_strided_slice %187 {offsets = [0, 16], sizes = [16, 16], strides = [1, 1]} : vector<16x192xf32> to vector<16x16xf32>
    %220 = vector.shape_cast %219 : vector<16x16xf32> to vector<2x8x16xf32>
    %221 = vector.extract_strided_slice %187 {offsets = [0, 80], sizes = [16, 16], strides = [1, 1]} : vector<16x192xf32> to vector<16x16xf32>
    %222 = vector.shape_cast %221 : vector<16x16xf32> to vector<2x8x16xf32>
    %223 = vector.extract_strided_slice %187 {offsets = [0, 144], sizes = [16, 16], strides = [1, 1]} : vector<16x192xf32> to vector<16x16xf32>
    %224 = vector.shape_cast %223 : vector<16x16xf32> to vector<2x8x16xf32>
    "tpu.trace_start"() <{level = 10 : i32, message = "bqd,bkd->bqk"}> : () -> ()
    %cst_94 = arith.constant dense<0.000000e+00> : vector<2x8x8xf32>
    %225 = tpu.matmul %220, %222, %cst_94 {dimension_numbers = #tpu.dot_dimension_numbers<[2], [2], [1], [1], [0, 0, 0, 1, 1, 1], [0], [0]>} : vector<2x8x16xf32>, vector<2x8x16xf32>, vector<2x8x8xf32> -> vector<2x8x8xf32>
    "tpu.trace_stop"() : () -> ()
    %cst_95 = arith.constant 2.500000e-01 : f32
    %226 = vector.broadcast %cst_95 : f32 to vector<2x8x8xf32>
    %227 = arith.mulf %225, %226 : vector<2x8x8xf32>
    %cst_96 = arith.constant dense<0xFF800000> : vector<2x8xf32>
    %228 = vector.multi_reduction <maximumf>, %227, %cst_96 [2] : vector<2x8x8xf32> to vector<2x8xf32>
    %229 = vector.shape_cast %228 : vector<2x8xf32> to vector<2x8x1xf32>
    %230 = vector.broadcast %229 : vector<2x8x1xf32> to vector<2x8x8xf32>
    %231 = arith.subf %227, %230 : vector<2x8x8xf32>
    %232 = math.exp %231 : vector<2x8x8xf32>
    %cst_97 = arith.constant dense<0.000000e+00> : vector<2x8xf32>
    %233 = vector.multi_reduction <add>, %232, %cst_97 [2] : vector<2x8x8xf32> to vector<2x8xf32>
    %234 = vector.shape_cast %233 : vector<2x8xf32> to vector<2x8x1xf32>
    %235 = tpu.reciprocal %234 {approx = true} : vector<2x8x1xf32> -> vector<2x8x1xf32>
    %236 = vector.broadcast %235 : vector<2x8x1xf32> to vector<2x8x8xf32>
    %237 = arith.mulf %232, %236 : vector<2x8x8xf32>
    "tpu.trace_start"() <{level = 10 : i32, message = "bqk,bkd->bqd"}> : () -> ()
    %cst_98 = arith.constant dense<0.000000e+00> : vector<2x8x16xf32>
    %238 = tpu.matmul %237, %224, %cst_98 {dimension_numbers = #tpu.dot_dimension_numbers<[2], [1], [1], [2], [0, 0, 0, 1, 1, 2], [0], [0]>} : vector<2x8x8xf32>, vector<2x8x16xf32>, vector<2x8x16xf32> -> vector<2x8x16xf32>
    "tpu.trace_stop"() : () -> ()
    %239 = vector.shape_cast %238 : vector<2x8x16xf32> to vector<16x16xf32>
    %240 = vector.extract_strided_slice %189 {offsets = [16, 0], sizes = [16, 64], strides = [1, 1]} : vector<64x64xf32> to vector<16x64xf32>
    %cst_99 = arith.constant dense<0.000000e+00> : vector<16x64xf32>
    %241 = tpu.matmul %239, %240, %cst_99 {dimension_numbers = #tpu.dot_dimension_numbers<[1], [0], [0], [1], [0, 0, 1, 1], [], []>} : vector<16x16xf32>, vector<16x64xf32>, vector<16x64xf32> -> vector<16x64xf32>
    %242 = arith.addf %218, %241 : vector<16x64xf32>
    %243 = vector.extract_strided_slice %187 {offsets = [0, 32], sizes = [16, 16], strides = [1, 1]} : vector<16x192xf32> to vector<16x16xf32>
    %244 = vector.shape_cast %243 : vector<16x16xf32> to vector<2x8x16xf32>
    %245 = vector.extract_strided_slice %187 {offsets = [0, 96], sizes = [16, 16], strides = [1, 1]} : vector<16x192xf32> to vector<16x16xf32>
    %246 = vector.shape_cast %245 : vector<16x16xf32> to vector<2x8x16xf32>
    %247 = vector.extract_strided_slice %187 {offsets = [0, 160], sizes = [16, 16], strides = [1, 1]} : vector<16x192xf32> to vector<16x16xf32>
    %248 = vector.shape_cast %247 : vector<16x16xf32> to vector<2x8x16xf32>
    "tpu.trace_start"() <{level = 10 : i32, message = "bqd,bkd->bqk"}> : () -> ()
    %cst_100 = arith.constant dense<0.000000e+00> : vector<2x8x8xf32>
    %249 = tpu.matmul %244, %246, %cst_100 {dimension_numbers = #tpu.dot_dimension_numbers<[2], [2], [1], [1], [0, 0, 0, 1, 1, 1], [0], [0]>} : vector<2x8x16xf32>, vector<2x8x16xf32>, vector<2x8x8xf32> -> vector<2x8x8xf32>
    "tpu.trace_stop"() : () -> ()
    %cst_101 = arith.constant 2.500000e-01 : f32
    %250 = vector.broadcast %cst_101 : f32 to vector<2x8x8xf32>
    %251 = arith.mulf %249, %250 : vector<2x8x8xf32>
    %cst_102 = arith.constant dense<0xFF800000> : vector<2x8xf32>
    %252 = vector.multi_reduction <maximumf>, %251, %cst_102 [2] : vector<2x8x8xf32> to vector<2x8xf32>
    %253 = vector.shape_cast %252 : vector<2x8xf32> to vector<2x8x1xf32>
    %254 = vector.broadcast %253 : vector<2x8x1xf32> to vector<2x8x8xf32>
    %255 = arith.subf %251, %254 : vector<2x8x8xf32>
    %256 = math.exp %255 : vector<2x8x8xf32>
    %cst_103 = arith.constant dense<0.000000e+00> : vector<2x8xf32>
    %257 = vector.multi_reduction <add>, %256, %cst_103 [2] : vector<2x8x8xf32> to vector<2x8xf32>
    %258 = vector.shape_cast %257 : vector<2x8xf32> to vector<2x8x1xf32>
    %259 = tpu.reciprocal %258 {approx = true} : vector<2x8x1xf32> -> vector<2x8x1xf32>
    %260 = vector.broadcast %259 : vector<2x8x1xf32> to vector<2x8x8xf32>
    %261 = arith.mulf %256, %260 : vector<2x8x8xf32>
    "tpu.trace_start"() <{level = 10 : i32, message = "bqk,bkd->bqd"}> : () -> ()
    %cst_104 = arith.constant dense<0.000000e+00> : vector<2x8x16xf32>
    %262 = tpu.matmul %261, %248, %cst_104 {dimension_numbers = #tpu.dot_dimension_numbers<[2], [1], [1], [2], [0, 0, 0, 1, 1, 2], [0], [0]>} : vector<2x8x8xf32>, vector<2x8x16xf32>, vector<2x8x16xf32> -> vector<2x8x16xf32>
    "tpu.trace_stop"() : () -> ()
    %263 = vector.shape_cast %262 : vector<2x8x16xf32> to vector<16x16xf32>
    %264 = vector.extract_strided_slice %189 {offsets = [32, 0], sizes = [16, 64], strides = [1, 1]} : vector<64x64xf32> to vector<16x64xf32>
    %cst_105 = arith.constant dense<0.000000e+00> : vector<16x64xf32>
    %265 = tpu.matmul %263, %264, %cst_105 {dimension_numbers = #tpu.dot_dimension_numbers<[1], [0], [0], [1], [0, 0, 1, 1], [], []>} : vector<16x16xf32>, vector<16x64xf32>, vector<16x64xf32> -> vector<16x64xf32>
    %266 = arith.addf %242, %265 : vector<16x64xf32>
    %267 = vector.extract_strided_slice %187 {offsets = [0, 48], sizes = [16, 16], strides = [1, 1]} : vector<16x192xf32> to vector<16x16xf32>
    %268 = vector.shape_cast %267 : vector<16x16xf32> to vector<2x8x16xf32>
    %269 = vector.extract_strided_slice %187 {offsets = [0, 112], sizes = [16, 16], strides = [1, 1]} : vector<16x192xf32> to vector<16x16xf32>
    %270 = vector.shape_cast %269 : vector<16x16xf32> to vector<2x8x16xf32>
    %271 = vector.extract_strided_slice %187 {offsets = [0, 176], sizes = [16, 16], strides = [1, 1]} : vector<16x192xf32> to vector<16x16xf32>
    %272 = vector.shape_cast %271 : vector<16x16xf32> to vector<2x8x16xf32>
    "tpu.trace_start"() <{level = 10 : i32, message = "bqd,bkd->bqk"}> : () -> ()
    %cst_106 = arith.constant dense<0.000000e+00> : vector<2x8x8xf32>
    %273 = tpu.matmul %268, %270, %cst_106 {dimension_numbers = #tpu.dot_dimension_numbers<[2], [2], [1], [1], [0, 0, 0, 1, 1, 1], [0], [0]>} : vector<2x8x16xf32>, vector<2x8x16xf32>, vector<2x8x8xf32> -> vector<2x8x8xf32>
    "tpu.trace_stop"() : () -> ()
    %cst_107 = arith.constant 2.500000e-01 : f32
    %274 = vector.broadcast %cst_107 : f32 to vector<2x8x8xf32>
    %275 = arith.mulf %273, %274 : vector<2x8x8xf32>
    %cst_108 = arith.constant dense<0xFF800000> : vector<2x8xf32>
    %276 = vector.multi_reduction <maximumf>, %275, %cst_108 [2] : vector<2x8x8xf32> to vector<2x8xf32>
    %277 = vector.shape_cast %276 : vector<2x8xf32> to vector<2x8x1xf32>
    %278 = vector.broadcast %277 : vector<2x8x1xf32> to vector<2x8x8xf32>
    %279 = arith.subf %275, %278 : vector<2x8x8xf32>
    %280 = math.exp %279 : vector<2x8x8xf32>
    %cst_109 = arith.constant dense<0.000000e+00> : vector<2x8xf32>
    %281 = vector.multi_reduction <add>, %280, %cst_109 [2] : vector<2x8x8xf32> to vector<2x8xf32>
    %282 = vector.shape_cast %281 : vector<2x8xf32> to vector<2x8x1xf32>
    %283 = tpu.reciprocal %282 {approx = true} : vector<2x8x1xf32> -> vector<2x8x1xf32>
    %284 = vector.broadcast %283 : vector<2x8x1xf32> to vector<2x8x8xf32>
    %285 = arith.mulf %280, %284 : vector<2x8x8xf32>
    "tpu.trace_start"() <{level = 10 : i32, message = "bqk,bkd->bqd"}> : () -> ()
    %cst_110 = arith.constant dense<0.000000e+00> : vector<2x8x16xf32>
    %286 = tpu.matmul %285, %272, %cst_110 {dimension_numbers = #tpu.dot_dimension_numbers<[2], [1], [1], [2], [0, 0, 0, 1, 1, 2], [0], [0]>} : vector<2x8x8xf32>, vector<2x8x16xf32>, vector<2x8x16xf32> -> vector<2x8x16xf32>
    "tpu.trace_stop"() : () -> ()
    %287 = vector.shape_cast %286 : vector<2x8x16xf32> to vector<16x16xf32>
    %288 = vector.extract_strided_slice %189 {offsets = [48, 0], sizes = [16, 64], strides = [1, 1]} : vector<64x64xf32> to vector<16x64xf32>
    %cst_111 = arith.constant dense<0.000000e+00> : vector<16x64xf32>
    %289 = tpu.matmul %287, %288, %cst_111 {dimension_numbers = #tpu.dot_dimension_numbers<[1], [0], [0], [1], [0, 0, 1, 1], [], []>} : vector<16x16xf32>, vector<16x64xf32>, vector<16x64xf32> -> vector<16x64xf32>
    %290 = arith.addf %266, %289 : vector<16x64xf32>
    %291 = arith.addf %180, %290 : vector<16x64xf32>
    %c1_112 = arith.constant 1 : index
    %c0_113 = arith.constant 0 : index
    %c0_114 = arith.constant 0 : index
    %292 = vector.load %arg5[%c1_112, %c0_113, %c0_114] : memref<2x1x64xf32, #tpu.memory_space<vmem>>, vector<1x1x64xf32>
    %293 = vector.shape_cast %292 : vector<1x1x64xf32> to vector<1x64xf32>
    %c1_115 = arith.constant 1 : index
    %c0_116 = arith.constant 0 : index
    %c0_117 = arith.constant 0 : index
    %294 = vector.load %arg6[%c1_115, %c0_116, %c0_117] : memref<2x1x64xf32, #tpu.memory_space<vmem>>, vector<1x1x64xf32>
    %295 = vector.shape_cast %294 : vector<1x1x64xf32> to vector<1x64xf32>
    %cst_118 = arith.constant dense<0.000000e+00> : vector<16xf32>
    %296 = vector.multi_reduction <add>, %291, %cst_118 [1] : vector<16x64xf32> to vector<16xf32>
    %297 = vector.shape_cast %296 : vector<16xf32> to vector<16x1xf32>
    %cst_119 = arith.constant 6.400000e+01 : f32
    %298 = vector.broadcast %cst_119 : f32 to vector<16x1xf32>
    %299 = arith.divf %297, %298 : vector<16x1xf32>
    %300 = vector.broadcast %299 : vector<16x1xf32> to vector<16x64xf32>
    %301 = arith.subf %291, %300 : vector<16x64xf32>
    %302 = arith.mulf %301, %301 : vector<16x64xf32>
    %cst_120 = arith.constant dense<0.000000e+00> : vector<16xf32>
    %303 = vector.multi_reduction <add>, %302, %cst_120 [1] : vector<16x64xf32> to vector<16xf32>
    %304 = vector.shape_cast %303 : vector<16xf32> to vector<16x1xf32>
    %cst_121 = arith.constant 6.400000e+01 : f32
    %305 = vector.broadcast %cst_121 : f32 to vector<16x1xf32>
    %306 = arith.divf %304, %305 : vector<16x1xf32>
    %307 = vector.broadcast %299 : vector<16x1xf32> to vector<16x64xf32>
    %308 = arith.subf %291, %307 : vector<16x64xf32>
    %cst_122 = arith.constant 9.99999974E-6 : f32
    %309 = vector.broadcast %cst_122 : f32 to vector<16x1xf32>
    %310 = arith.addf %306, %309 : vector<16x1xf32>
    %311 = math.rsqrt %310 : vector<16x1xf32>
    %312 = vector.broadcast %311 : vector<16x1xf32> to vector<16x64xf32>
    %313 = arith.mulf %308, %312 : vector<16x64xf32>
    %314 = vector.broadcast %293 : vector<1x64xf32> to vector<16x64xf32>
    %315 = arith.mulf %313, %314 : vector<16x64xf32>
    %316 = vector.broadcast %295 : vector<1x64xf32> to vector<16x64xf32>
    %317 = arith.addf %315, %316 : vector<16x64xf32>
    %c1_123 = arith.constant 1 : index
    %c0_124 = arith.constant 0 : index
    %c0_125 = arith.constant 0 : index
    %318 = vector.load %arg7[%c1_123, %c0_124, %c0_125] : memref<2x64x256xf32, #tpu.memory_space<vmem>>, vector<1x64x256xf32>
    %319 = vector.shape_cast %318 : vector<1x64x256xf32> to vector<64x256xf32>
    %cst_126 = arith.constant dense<0.000000e+00> : vector<16x256xf32>
    %320 = tpu.matmul %317, %319, %cst_126 {dimension_numbers = #tpu.dot_dimension_numbers<[1], [0], [0], [1], [0, 0, 1, 1], [], []>} : vector<16x64xf32>, vector<64x256xf32>, vector<16x256xf32> -> vector<16x256xf32>
    %c1_127 = arith.constant 1 : index
    %c0_128 = arith.constant 0 : index
    %c0_129 = arith.constant 0 : index
    %321 = vector.load %arg8[%c1_127, %c0_128, %c0_129] : memref<2x1x256xf32, #tpu.memory_space<vmem>>, vector<1x1x256xf32>
    %322 = vector.shape_cast %321 : vector<1x1x256xf32> to vector<1x256xf32>
    %323 = vector.broadcast %322 : vector<1x256xf32> to vector<16x256xf32>
    %324 = arith.addf %320, %323 : vector<16x256xf32>
    %cst_130 = arith.constant 0.000000e+00 : f32
    %325 = vector.broadcast %cst_130 : f32 to vector<16x256xf32>
    %326 = arith.maximumf %324, %325 : vector<16x256xf32>
    %c1_131 = arith.constant 1 : index
    %c0_132 = arith.constant 0 : index
    %c0_133 = arith.constant 0 : index
    %327 = vector.load %arg9[%c1_131, %c0_132, %c0_133] : memref<2x256x64xf32, #tpu.memory_space<vmem>>, vector<1x256x64xf32>
    %328 = vector.shape_cast %327 : vector<1x256x64xf32> to vector<256x64xf32>
    %cst_134 = arith.constant dense<0.000000e+00> : vector<16x64xf32>
    %329 = tpu.matmul %326, %328, %cst_134 {dimension_numbers = #tpu.dot_dimension_numbers<[1], [0], [0], [1], [0, 0, 1, 1], [], []>} : vector<16x256xf32>, vector<256x64xf32>, vector<16x64xf32> -> vector<16x64xf32>
    %c1_135 = arith.constant 1 : index
    %c0_136 = arith.constant 0 : index
    %c0_137 = arith.constant 0 : index
    %330 = vector.load %arg10[%c1_135, %c0_136, %c0_137] : memref<2x1x64xf32, #tpu.memory_space<vmem>>, vector<1x1x64xf32>
    %331 = vector.shape_cast %330 : vector<1x1x64xf32> to vector<1x64xf32>
    %332 = vector.broadcast %331 : vector<1x64xf32> to vector<16x64xf32>
    %333 = arith.addf %329, %332 : vector<16x64xf32>
    %334 = arith.addf %317, %333 : vector<16x64xf32>
    %c1_138 = arith.constant 1 : index
    %c0_139 = arith.constant 0 : index
    %c0_140 = arith.constant 0 : index
    %335 = vector.load %arg11[%c1_138, %c0_139, %c0_140] : memref<2x1x64xf32, #tpu.memory_space<vmem>>, vector<1x1x64xf32>
    %336 = vector.shape_cast %335 : vector<1x1x64xf32> to vector<1x64xf32>
    %c1_141 = arith.constant 1 : index
    %c0_142 = arith.constant 0 : index
    %c0_143 = arith.constant 0 : index
    %337 = vector.load %arg12[%c1_141, %c0_142, %c0_143] : memref<2x1x64xf32, #tpu.memory_space<vmem>>, vector<1x1x64xf32>
    %338 = vector.shape_cast %337 : vector<1x1x64xf32> to vector<1x64xf32>
    %cst_144 = arith.constant dense<0.000000e+00> : vector<16xf32>
    %339 = vector.multi_reduction <add>, %334, %cst_144 [1] : vector<16x64xf32> to vector<16xf32>
    %340 = vector.shape_cast %339 : vector<16xf32> to vector<16x1xf32>
    %cst_145 = arith.constant 6.400000e+01 : f32
    %341 = vector.broadcast %cst_145 : f32 to vector<16x1xf32>
    %342 = arith.divf %340, %341 : vector<16x1xf32>
    %343 = vector.broadcast %342 : vector<16x1xf32> to vector<16x64xf32>
    %344 = arith.subf %334, %343 : vector<16x64xf32>
    %345 = arith.mulf %344, %344 : vector<16x64xf32>
    %cst_146 = arith.constant dense<0.000000e+00> : vector<16xf32>
    %346 = vector.multi_reduction <add>, %345, %cst_146 [1] : vector<16x64xf32> to vector<16xf32>
    %347 = vector.shape_cast %346 : vector<16xf32> to vector<16x1xf32>
    %cst_147 = arith.constant 6.400000e+01 : f32
    %348 = vector.broadcast %cst_147 : f32 to vector<16x1xf32>
    %349 = arith.divf %347, %348 : vector<16x1xf32>
    %350 = vector.broadcast %342 : vector<16x1xf32> to vector<16x64xf32>
    %351 = arith.subf %334, %350 : vector<16x64xf32>
    %cst_148 = arith.constant 9.99999974E-6 : f32
    %352 = vector.broadcast %cst_148 : f32 to vector<16x1xf32>
    %353 = arith.addf %349, %352 : vector<16x1xf32>
    %354 = math.rsqrt %353 : vector<16x1xf32>
    %355 = vector.broadcast %354 : vector<16x1xf32> to vector<16x64xf32>
    %356 = arith.mulf %351, %355 : vector<16x64xf32>
    %357 = vector.broadcast %336 : vector<1x64xf32> to vector<16x64xf32>
    %358 = arith.mulf %356, %357 : vector<16x64xf32>
    %359 = vector.broadcast %338 : vector<1x64xf32> to vector<16x64xf32>
    %360 = arith.addf %358, %359 : vector<16x64xf32>
    %361 = vector.shape_cast %360 : vector<16x64xf32> to vector<2x8x64xf32>
    %362 = vector.extract_strided_slice %361 {offsets = [0, 7, 0], sizes = [2, 1, 64], strides = [1, 1, 1]} : vector<2x8x64xf32> to vector<2x1x64xf32>
    %363 = vector.shape_cast %362 : vector<2x1x64xf32> to vector<2x64xf32>
    %c0_149 = arith.constant 0 : index
    %c0_150 = arith.constant 0 : index
    %364 = vector.load %arg13[%c0_149, %c0_150] : memref<1x64xf32, #tpu.memory_space<vmem>>, vector<1x64xf32>
    %365 = vector.broadcast %364 : vector<1x64xf32> to vector<2x64xf32>
    %366 = arith.mulf %363, %365 : vector<2x64xf32>
    %cst_151 = arith.constant dense<0.000000e+00> : vector<2xf32>
    %367 = vector.multi_reduction <add>, %366, %cst_151 [1] : vector<2x64xf32> to vector<2xf32>
    %368 = vector.shape_cast %367 : vector<2xf32> to vector<2x1xf32>
    %c0_152 = arith.constant 0 : index
    %c0_153 = arith.constant 0 : index
    %369 = vector.load %arg14[%c0_152, %c0_153] : memref<1x1xf32, #tpu.memory_space<vmem>>, vector<1x1xf32>
    %370 = vector.broadcast %369 : vector<1x1xf32> to vector<2x1xf32>
    %371 = arith.addf %368, %370 : vector<2x1xf32>
    %c0_154 = arith.constant 0 : index
    %c0_155 = arith.constant 0 : index
    %372 = vector.load %arg15[%c0_154, %c0_155] : memref<2x1xf32, #tpu.memory_space<vmem>>, vector<2x1xf32>
    tpu.vector_store %arg15[%c0_154, %c0_155], %371 {strides = array<i32>} : memref<2x1xf32, #tpu.memory_space<vmem>>, vector<2x1xf32>,
    return
  }
}

</mosaic_0001>

<bundles_post_ra>
// kernel: tpu_custom_call.1
= control target key start
LH: loop header
LB: loop body
LE: loop exit
PB: predicated region body
PF: predicated region fallthrough
CT: control target
= control target key end

     0   :  { %v5132_v3 = vmov 0.0   ;;  %vm82_vm0 = vcmask 523264   ;;  %v72_v27 = vlaneseq  ;;  %vm5133_vm1 = vmmov 0   ;;  %s5135_s26 = smov 48   ;;  %s5136_s27 = smov 112   ;;  %s6095_s1 = inlined_call_operand.vmem [shape: f32[2,64,192], index: 1, kind: input, shape index: {}]   ;;  %s6096_s0 = inlined_call_operand.vmem [shape: f32[16,64], index: 0, kind: input, shape index: {}]   ;;  %s6097_s2 = inlined_call_operand.vmem [shape: f32[2,1,192], index: 2, kind: input, shape index: {}]   ;;  %s6098_s3 = inlined_call_operand.vmem [shape: f32[2,64,64], index: 3, kind: input, shape index: {}]   ;;  %s6099_s4 = inlined_call_operand.vmem [shape: f32[2,1,64], index: 4, kind: input, shape index: {}]   ;;  %s6100_s7 = inlined_call_operand.vmem [shape: f32[2,64,256], index: 7, kind: input, shape index: {}]   ;;  %s6101_s9 = inlined_call_operand.vmem [shape: f32[2,256,64], index: 9, kind: input, shape index: {}]   ;;  %s6102_s5 = inlined_call_operand.vmem [shape: f32[2,1,64], index: 5, kind: input, shape index: {}]   ;;  %s6103_s6 = inlined_call_operand.vmem [shape: f32[2,1,64], index: 6, kind: input, shape index: {}]   ;;  %s6104_s8 = inlined_call_operand.vmem [shape: f32[2,1,256], index: 8, kind: input, shape index: {}]   ;;  %s6105_s10 = inlined_call_operand.vmem [shape: f32[2,1,64], index: 10, kind: input, shape index: {}]   ;;  %s6106_s11 = inlined_call_operand.vmem [shape: f32[2,1,64], index: 11, kind: input, shape index: {}]   ;;  %s6107_s12 = inlined_call_operand.vmem [shape: f32[2,1,64], index: 12, kind: input, shape index: {}]   ;;  %s6108_s14 = inlined_call_operand.<no memory space> [shape: f32[1,1], index: 14, kind: input, shape index: {}]   ;;  %s6109_s13 = inlined_call_operand.vmem [shape: f32[1,64], index: 13, kind: input, shape index: {}]   ;;  %s6110_s15 = inlined_call_operand.vmem [shape: f32[2,1], index: 15, kind: output, shape index: {}]  }
   0x1   :  { %v55_v0 = vld [vmem:[%s6095_s1 + $0x8] sm:$0xff]  ;;  %v57_v1 = vld [vmem:[%s6095_s1 + $0x18] sm:$0xff]  ;;  %v54_v2 = vld [vmem:[%s6095_s1] sm:$0xff]  ;;  %153 = vmatprep.mubr.f32.mxu0 %v5132_v3  ;;  %4661 = vmatprep.subr.mxu1 %v5132_v3  ;;  %vm185_vm2 = vcmask 130048   ;;  %vm339_vm3 = vcmask 64512   ;;  %s5137_s17 = smov 32  }
   0x2   :  { %v4867_v4 = vpack.c.bf16 %v57_v1, %v55_v0  ;;  %v56_v5 = vld [vmem:[%s6095_s1 + $0x10] sm:$0xff]  ;;  %v59_v6 = vld [vmem:[%s6095_s1 + $0x28] sm:$0xff]  ;;  %v61_v7 = vld [vmem:[%s6095_s1 + $0x38] sm:$0xff]  ;;  %v73_v28 = vshrl.u32 %v72_v27, 7  ;;  %4663 = vmatprep.mubr.msk.f32.mxu1 %vm5133_vm1, %v5132_v3  ;;  %s5138_s18 = smov 96   ;;  %s6111_s19 = smov 80  }
   0x3   :  { %v4869_v8 = vpack.c.bf16 %v56_v5, %v54_v2  ;;  %v4871_v9 = vpack.c.bf16 %v61_v7, %v59_v6  ;;  %v58_v10 = vld [vmem:[%s6095_s1 + $0x20] sm:$0xff]  ;;  %v60_v11 = vld [vmem:[%s6095_s1 + $0x30] sm:$0xff]  ;;  %v63_v12 = vld [vmem:[%s6095_s1 + $0x48] sm:$0xff]  ;;  %s6113_s24 = smov 16   ;;  %s6116_s16 = smov 80   ;;  %vm4288_vm4 = vcmask 523271  }
   0x4   :  { %4868 = vmatprep.subr.bf16.mxu0 %v4867_v4  ;;  %v65_v13 = vld [vmem:[%s6095_s1 + $0x58] sm:$0xff]  ;;  %v4873_v14 = vpack.c.bf16 %v60_v11, %v58_v10  ;;  %v62_v16 = vld [vmem:[%s6095_s1 + $0x40] sm:$0xff]  ;;  %v64_v17 = vld [vmem:[%s6095_s1 + $0x50] sm:$0xff]  ;;  %v5291_v29 = vsub.s32 0, %v73_v28  ;;  %v5296_v31 = vsub.s32 1, %v73_v28  ;;  %vm4292_vm5 = vcmask 516096  }
   0x5   :  { %4870 = vmatpush1.bf16.msra.mxu0 %v4869_v8  ;;  %v4875_v15 = vpack.c.bf16 %v65_v13, %v63_v12  ;;  %v67_v18 = vld [vmem:[%s6095_s1 + $0x68] sm:$0xff]  ;;  %v69_v19 = vld [vmem:[%s6095_s1 + $0x78] sm:$0xff]  ;;  %v4877_v20 = vpack.c.bf16 %v64_v17, %v62_v16  ;;  %v66_v22 = vld [vmem:[%s6095_s1 + $0x60] sm:$0xff]  ;;  %vm4305_vm6 = vcmask 7175   ;;  %vm4307_vm7 = vcmask 0  }
   0x6   :  { %4872 = vmatprep.subr.bf16.mxu0 %v4871_v9  ;;  %v4879_v21 = vpack.c.bf16 %v69_v19, %v67_v18  ;;  %v68_v23 = vld [vmem:[%s6095_s1 + $0x70] sm:$0xff]  ;;  %v5274_v25 = vld [vmem:[%s6096_s0] sm:$0xff]  ;;  %v5283_v26 = vld [vmem:[%s6096_s0 + $0x8] sm:$0xff]  ;;  %s5134_s0 = smov 64  }
   0x7   :  { %v4881_v24 = vpack.c.bf16 %v68_v23, %v66_v22  ;;  %v70_v30 = vld [vmem:[%s6097_s2] sm:$0x3]  ;;  %v167_v2 = vld [vmem:[%s6098_s3 + $0x8] sm:$0xff] }
   0x8   :  { %v75_v32 = vrot.slane %v70_v30, %v5291_v29  ;;  %v79_v33 = vrot.slane %v70_v30, %v5296_v31  ;;  %v166_v1 = vld [vmem:[%s6098_s3] sm:$0xff] }
   0x9   :  { %4874 = vmatpush1.bf16.msra.mxu0 %v4873_v14  ;;  %v4883_v7 = vpack.c.bf16 %v167_v2, %v166_v1  ;;  %v169_v1 = vld [vmem:[%s6098_s3 + $0x18] sm:$0xff] }
   0xa   :  { %4876 = vmatprep.subr.bf16.mxu0 %v4875_v15 }
   0xd   :  { %4878 = vmatpush1.bf16.msra.mxu0 %v4877_v20 }
   0xe   :  { %4880 = vmatprep.subr.bf16.mxu0 %v4879_v21 }
  0x11   :  { %4882 = vmatpush1.bf16.msra.mxu0 %v4881_v24 }
  0x12   :  { %4651 = vmatprep.subr.mxu0 %v5132_v3 }
  0x14   :  { %4313 = vmatmul.mubr.msk.f32.vlgmr.msra.gmra.mrb[0].mxu0 %vm82_vm0, %v5274_v25 }
  0x15   :  { %159 = vmatprep.mubr.f32.mxu0 %v5132_v3 }
  0x18   :  { %4314 = vmatmul.mubr.msk.f32.gmra.mrb[2].mxu0 %vm82_vm0, %v5283_v26 }
  0x19   :  { %4653 = vmatprep.mubr.msk.f32.mxu0 %vm5133_vm1, %v5132_v3 }
  0xe7   :  { %v155_v34 = vpop.f32.mrb[0].mxu0 }
  0xe8   :  { %v5300_v35 = vadd.f32 %v155_v34, %v75_v32  ;;  %v157_v36 = vpop.f32.mrb[1].mxu0 }
  0xe9   :  { %v5302_v37 = vadd.f32 %v157_v36, %v79_v33 }
  0xea   :  { %183 = vrot.lane.b32.xlu0 %v5300_v35, %s5134_s0 }
  0xeb   :  { %v161_v38 = vpop.f32.mrb[2].mxu0  ;;  %4662 = vmatpush3.msra.mxu1 %v5302_v37 }
  0xec   :  { %v5307_v39 = vadd.f32 %v161_v38, %v75_v32  ;;  %v163_v40 = vpop.f32.mrb[3].mxu0  ;;  %4666 = vmatprep.subr.mxu1 %v5132_v3 }
  0xed   :  { %v5310_v41 = vadd.f32 %v163_v40, %v79_v33 }
  0xee   :  { %261 = vrot.lane.b32.xlu0 %v5307_v39, %s5134_s0 }
 0x15c   :  { %v184_v42 = vpop.permute.xlu0 %183 }
 0x15d   :  { %4652 = vmatpush3.xpose.msk.msra.mxu0 %vm185_vm2, %v184_v42 }
 0x15e   :  { %4656 = vmatprep.subr.mxu0 %v5132_v3 }
 0x160   :  { %4654 = vmatmul.mubr.msk.f32.vlgmr.msra.gmra.mrb[4].mxu0 %vm185_vm2, %v5300_v35  ;;  %v262_v43 = vpop.permute.xlu0 %261 }
 0x161   :  { %4657 = vmatpush3.xpose.msk.msra.mxu0 %vm185_vm2, %v262_v43  ;;  %4658 = vmatprep.mubr.msk.f32.mxu0 %vm5133_vm1, %v5132_v3 }
 0x162   :  { %4678 = vmatprep.subr.mxu0 %v5132_v3 }
 0x164   :  { %4659 = vmatmul.mubr.msk.f32.vlgmr.msra.gmra.mrb[6].mxu0 %vm185_vm2, %v5307_v39 }
 0x165   :  { %4680 = vmatprep.mubr.msk.f32.mxu0 %vm5133_vm1, %v5132_v3 }
 0x233   :  { %v256_v44 = vpop.f32.mrb[4].mxu0 }
 0x234   :  { %v337_v45 = vmul.f32 0.25, %v256_v44  ;;  %v4655_v46 = vpop.f32.mrb[5].mxu0 }
 0x236   :  { %v340_v47 = vsel %vm339_vm3, %v337_v45, -inf }
 0x237   :  { %341 = vmax.xlane.f32.xlu1 %v340_v47  ;;  %v333_v48 = vpop.f32.mrb[6].mxu0 }
 0x238   :  { %v338_v49 = vmul.f32 0.25, %v333_v48  ;;  %v4660_v50 = vpop.f32.mrb[7].mxu0 }
 0x23a   :  { %v343_v51 = vsel %vm339_vm3, %v338_v49, -inf }
 0x23b   :  { %344 = vmax.xlane.f32.xlu1 %v343_v51 }
 0x2c4   :  { %v342_v52 = vpop.xlane.xlu1 %341 }
 0x2c5   :  { %v346_v53 = vsub.f32 %v337_v45, %v342_v52 }
 0x2c7   :  { %v348_v54 = vmul.f32 1.442695, %v346_v53 }
 0x2c8   :  { %v345_v55 = vpop.xlane.xlu1 %344 }
 0x2c9   :  { %5052 = vpow2.f32 %v348_v54  ;;  %v347_v56 = vsub.f32 %v338_v49, %v345_v55 }
 0x2cb   :  { %v350_v57 = vmul.f32 1.442695, %v347_v56 }
 0x2cd   :  { %5054 = vpow2.f32 %v350_v57 }
 0x2d3   :  { %v5053_v58 = vpop.eup %5052 }
 0x2d4   :  { %v352_v59 = vsel %vm339_vm3, %v5053_v58, 0.0 }
 0x2d5   :  { %353 = vadd.xlane.f32.xlu0 %v352_v59 }
 0x2d7   :  { %v5055_v60 = vpop.eup %5054 }
 0x2d8   :  { %v355_v61 = vsel %vm339_vm3, %v5055_v60, 0.0 }
 0x2d9   :  { %356 = vadd.xlane.f32.xlu1 %v355_v61 }
 0x2ea   :  { %593 = vrot.lane.b32.xlu1 %v5300_v35, %s5135_s26 }
 0x2ee   :  { %591 = vrot.lane.b32.xlu1 %v5300_v35, %s5136_s27 }
 0x2f2   :  { %671 = vrot.lane.b32.xlu1 %v5307_v39, %s5135_s26 }
 0x2f6   :  { %669 = vrot.lane.b32.xlu1 %v5307_v39, %s5136_s27 }
 0x362   :  { %v354_v62 = vpop.xlane.xlu0 %353 }
 0x363   :  { %5056 = vrcp.f32 %v354_v62 }
 0x366   :  { %v357_v63 = vpop.xlane.xlu1 %356 }
 0x367   :  { %5058 = vrcp.f32 %v357_v63 }
 0x36a   :  { %v594_v0 = vpop.permute.xlu1 %593 }
 0x36b   :  { %4679 = vmatpush3.xpose.msk.msra.mxu0 %vm185_vm2, %v594_v0  ;;  %v168_v0 = vld [vmem:[%s6098_s3 + $0x10] sm:$0xff] }
 0x36c   :  { %4688 = vmatprep.subr.mxu0 %v5132_v3  ;;  %v4887_v2 = vpack.c.bf16 %v169_v1, %v168_v0 }
 0x36d   :  { %v5057_v4 = vpop.eup %5056 }
 0x36e   :  { %v592_v5 = vpop.permute.xlu1 %591  ;;  %v360_v6 = vmul.f32 %v5057_v4, %v5053_v58 }
 0x36f   :  { %4681 = vmatmul.mubr.msk.f32.vlgmr.msra.gmra.mrb[8].mxu0 %vm185_vm2, %v592_v5 }
 0x370   :  { %4664 = vmatmul.mubr.msk.f32.vlgmr.msra.gmra.mrb[0].mxu1 %vm339_vm3, %v360_v6  ;;  %4690 = vmatprep.mubr.msk.f32.mxu0 %vm5133_vm1, %v5132_v3 }
 0x371   :  { %v5059_v8 = vpop.eup %5058  ;;  %4667 = vmatpush3.msra.mxu1 %v5310_v41  ;;  %4668 = vmatprep.mubr.msk.f32.mxu1 %vm5133_vm1, %v5132_v3 }
 0x372   :  { %v361_v9 = vmul.f32 %v5059_v8, %v5055_v60  ;;  %4884 = vmatprep.subr.bf16.mxu1 %v4883_v7  ;;  %v672_v15 = vpop.permute.xlu1 %671 }
 0x374   :  { %4669 = vmatmul.mubr.msk.f32.vlgmr.msra.gmra.mrb[2].mxu1 %vm339_vm3, %v361_v9 }
 0x375   :  { %4886 = vmatpush3.bf16.msra.mxu1 %v4883_v7 }
 0x376   :  { %4683 = vmatprep.subr.mxu1 %v5132_v3  ;;  %v670_v19 = vpop.permute.xlu1 %669 }
 0x442   :  { %v665_v10 = vpop.f32.mrb[8].mxu0 }
 0x443   :  { %v747_v11 = vmul.f32 0.25, %v665_v10  ;;  %v431_v12 = vpop.f32.mrb[0].mxu1  ;;  %v4682_v13 = vpop.f32.mrb[9].mxu0 }
 0x444   :  { %v4665_v14 = vpop.f32.mrb[1].mxu1  ;;  %4675 = vmatprep.mubr.msk.f32.mxu1 %vm185_vm2, %v431_v12 }
 0x445   :  { %v749_v16 = vsel %vm339_vm3, %v747_v11, -inf }
 0x446   :  { %750 = vmax.xlane.f32.xlu0 %v749_v16 }
 0x447   :  { %v504_v17 = vpop.f32.mrb[2].mxu1 }
 0x448   :  { %v4670_v18 = vpop.f32.mrb[3].mxu1  ;;  %4676 = vmatmul.mubr.msk.f32.vlgmr.msra.gmra.mrb[4].mxu1 %vm185_vm2, %v504_v17 }
 0x449   :  { %4684 = vmatpush3.xpose.msk.msra.mxu1 %vm185_vm2, %v672_v15  ;;  %4685 = vmatprep.mubr.msk.f32.mxu1 %vm5133_vm1, %v5132_v3  ;;  %v170_v18 = vld [vmem:[%s6098_s3 + $0x20] sm:$0xff] }
 0x44a   :  { %4693 = vmatprep.subr.mxu1 %v5132_v3 }
 0x44c   :  { %4686 = vmatmul.mubr.msk.f32.vlgmr.msra.gmra.mrb[6].mxu1 %vm185_vm2, %v670_v19 }
 0x44d   :  { %4695 = vmatprep.mubr.msk.f32.mxu1 %vm5133_vm1, %v5132_v3 }
 0x45c   :  { %772 = vrot.lane.b32.xlu0 %v5302_v37, %s5136_s27 }
 0x460   :  { %1010 = vrot.lane.b32.xlu0 %v5300_v35, %s5137_s17 }
 0x464   :  { %1008 = vrot.lane.b32.xlu0 %v5300_v35, %s5138_s18 }
 0x468   :  { %1088 = vrot.lane.b32.xlu0 %v5307_v39, %s5137_s17 }
 0x46c   :  { %1086 = vrot.lane.b32.xlu0 %v5307_v39, %s5138_s18 }
 0x4d3   :  { %v751_v20 = vpop.xlane.xlu0 %750 }
 0x4d4   :  { %v755_v21 = vsub.f32 %v747_v11, %v751_v20 }
 0x4d6   :  { %v757_v22 = vmul.f32 1.442695, %v755_v21 }
 0x4d7   :  { %v773_v23 = vpop.permute.xlu0 %772 }
 0x4d8   :  { %5060 = vpow2.f32 %v757_v22  ;;  %4689 = vmatpush3.msra.mxu0 %v773_v23 }
 0x4d9   :  { %4705 = vmatprep.subr.mxu0 %v5132_v3 }
 0x4db   :  { %v1011_v36 = vpop.permute.xlu0 %1010 }
 0x4df   :  { %v1009_v38 = vpop.permute.xlu0 %1008 }
 0x4e2   :  { %v5061_v24 = vpop.eup %5060 }
 0x4e3   :  { %v761_v27 = vsel %vm339_vm3, %v5061_v24, 0.0  ;;  %v1089_v43 = vpop.permute.xlu0 %1088 }
 0x4e4   :  { %762 = vadd.xlane.f32.xlu1 %v761_v27 }
 0x4e7   :  { %v1087_v44 = vpop.permute.xlu0 %1086 }
 0x51f   :  { %v743_v28 = vpop.f32.mrb[6].mxu1 }
 0x520   :  { %v748_v30 = vmul.f32 0.25, %v743_v28  ;;  %v4687_v32 = vpop.f32.mrb[7].mxu1 }
 0x522   :  { %v752_v33 = vsel %vm339_vm3, %v748_v30, -inf }
 0x523   :  { %753 = vmax.xlane.f32.xlu1 %v752_v33 }
 0x534   :  { %849 = vrot.lane.b32.xlu1 %v5310_v41, %s5136_s27 }
 0x571   :  { %v763_v34 = vpop.xlane.xlu1 %762 }
 0x572   :  { %5062 = vrcp.f32 %v763_v34 }
 0x57c   :  { %v5063_v40 = vpop.eup %5062 }
 0x57d   :  { %v769_v42 = vmul.f32 %v5063_v40, %v5061_v24 }
 0x57f   :  { %4691 = vmatmul.mubr.msk.f32.vlgmr.msra.gmra.mrb[10].mxu0 %vm339_vm3, %v769_v42 }
 0x580   :  { %4706 = vmatpush3.xpose.msk.msra.mxu0 %vm185_vm2, %v1011_v36  ;;  %4707 = vmatprep.mubr.msk.f32.mxu0 %vm5133_vm1, %v5132_v3 }
 0x581   :  { %4710 = vmatprep.subr.mxu0 %v5132_v3 }
 0x583   :  { %4708 = vmatmul.mubr.msk.f32.vlgmr.msra.gmra.mrb[12].mxu0 %vm185_vm2, %v1009_v38 }
 0x584   :  { %4711 = vmatpush3.xpose.msk.msra.mxu0 %vm185_vm2, %v1089_v43  ;;  %4712 = vmatprep.mubr.msk.f32.mxu0 %vm5133_vm1, %v5132_v3 }
 0x585   :  { %4720 = vmatprep.subr.mxu0 %v5132_v3 }
 0x587   :  { %4713 = vmatmul.mubr.msk.f32.vlgmr.msra.gmra.mrb[14].mxu0 %vm185_vm2, %v1087_v44 }
 0x588   :  { %4722 = vmatprep.mubr.msk.f32.mxu0 %vm5133_vm1, %v5132_v3 }
 0x5b0   :  { %v754_v45 = vpop.xlane.xlu1 %753 }
 0x5b1   :  { %v756_v46 = vsub.f32 %v748_v30, %v754_v45 }
 0x5b3   :  { %v759_v47 = vmul.f32 1.442695, %v756_v46 }
 0x5b4   :  { %v850_v48 = vpop.permute.xlu1 %849 }
 0x5b5   :  { %5064 = vpow2.f32 %v759_v47  ;;  %4694 = vmatpush3.msra.mxu1 %v850_v48 }
 0x5b6   :  { %4888 = vmatprep.subr.bf16.mxu1 %v4887_v2 }
 0x5bf   :  { %v5065_v49 = vpop.eup %5064 }
 0x5c0   :  { %v764_v50 = vsel %vm339_vm3, %v5065_v49, 0.0 }
 0x5c1   :  { %765 = vadd.xlane.f32.xlu0 %v764_v50 }
 0x64e   :  { %v766_v51 = vpop.xlane.xlu0 %765 }
 0x64f   :  { %5066 = vrcp.f32 %v766_v51 }
 0x652   :  { %v844_v52 = vpop.f32.mrb[10].mxu0 }
 0x653   :  { %v4692_v53 = vpop.f32.mrb[11].mxu0 }
 0x656   :  { %v1082_v54 = vpop.f32.mrb[12].mxu0 }
 0x657   :  { %v1164_v55 = vmul.f32 0.25, %v1082_v54  ;;  %v4709_v56 = vpop.f32.mrb[13].mxu0 }
 0x659   :  { %v5067_v57 = vpop.eup %5066  ;;  %v1166_v58 = vsel %vm339_vm3, %v1164_v55, -inf }
 0x65a   :  { %v770_v59 = vmul.f32 %v5067_v57, %v5065_v49  ;;  %1167 = vmax.xlane.f32.xlu1 %v1166_v58  ;;  %v1160_v60 = vpop.f32.mrb[14].mxu0 }
 0x65b   :  { %v1165_v61 = vmul.f32 0.25, %v1160_v60  ;;  %v4714_v62 = vpop.f32.mrb[15].mxu0 }
 0x65c   :  { %4696 = vmatmul.mubr.msk.f32.vlgmr.msra.gmra.mrb[8].mxu1 %vm339_vm3, %v770_v59 }
 0x65d   :  { %4702 = vmatprep.mubr.msk.f32.mxu1 %vm185_vm2, %v844_v52  ;;  %v1169_v63 = vsel %vm339_vm3, %v1165_v61, -inf  ;;  %4890 = vmatpush3.bf16.msra.mxu1 %v4887_v2 }
 0x65e   :  { %1170 = vmax.xlane.f32.xlu0 %v1169_v63  ;;  %4715 = vmatprep.subr.mxu1 %v5132_v3  ;;  %v173_v63 = vld [vmem:[%s6098_s3 + $0x38] sm:$0xff] }
 0x66b   :  { %1264 = vrot.lane.b32.xlu1 %v5310_v41, %s5138_s18 }
 0x66f   :  { %1423 = vrot.lane.b32.xlu1 %v5300_v35, %s6111_s19 }
 0x6e7   :  { %v1168_v4 = vpop.xlane.xlu1 %1167 }
 0x6e8   :  { %v1172_v5 = vsub.f32 %v1164_v55, %v1168_v4 }
 0x6ea   :  { %v1174_v6 = vmul.f32 1.442695, %v1172_v5 }
 0x6eb   :  { %v1265_v7 = vpop.permute.xlu1 %1264  ;;  %v1171_v8 = vpop.xlane.xlu0 %1170 }
 0x6ec   :  { %5068 = vpow2.f32 %v1174_v6  ;;  %v1173_v9 = vsub.f32 %v1165_v61, %v1171_v8  ;;  %4721 = vmatpush3.msra.mxu0 %v1265_v7 }
 0x6ed   :  { %4732 = vmatprep.subr.mxu0 %v5132_v3 }
 0x6ee   :  { %v1176_v10 = vmul.f32 1.442695, %v1173_v9  ;;  %v4315_v9 = vld [vmem:[%s6099_s4] ss:$0 sm:$0xff] }
 0x6ef   :  { %v1424_v28 = vpop.permute.xlu1 %1423 }
 0x6f0   :  { %5070 = vpow2.f32 %v1176_v10 }
 0x6f6   :  { %v5069_v11 = vpop.eup %5068 }
 0x6f7   :  { %v1178_v12 = vsel %vm339_vm3, %v5069_v11, 0.0 }
 0x6f8   :  { %1179 = vadd.xlane.f32.xlu0 %v1178_v12 }
 0x6fa   :  { %v5071_v13 = vpop.eup %5070 }
 0x6fb   :  { %v1181_v14 = vsel %vm339_vm3, %v5071_v13, 0.0 }
 0x6fc   :  { %1182 = vadd.xlane.f32.xlu0 %v1181_v14 }
 0x712   :  { %1188 = vrot.lane.b32.xlu0 %v5302_v37, %s5138_s18 }
 0x716   :  { %1425 = vrot.lane.b32.xlu0 %v5300_v35, %s6113_s24  ;;  %v171_v35 = vld [vmem:[%s6098_s3 + $0x28] sm:$0xff] }
 0x71a   :  { %1503 = vrot.lane.b32.xlu0 %v5307_v39, %s6113_s24 }
 0x71e   :  { %1501 = vrot.lane.b32.xlu0 %v5307_v39, %s6111_s19  ;;  %v4891_v39 = vpack.c.bf16 %v171_v35, %v170_v18 }
 0x72f   :  { %v921_v15 = vpop.f32.mrb[8].mxu1 }
 0x730   :  { %v4697_v16 = vpop.f32.mrb[9].mxu1  ;;  %4703 = vmatmul.mubr.msk.f32.vlgmr.msra.gmra.mrb[4].mxu1 %vm185_vm2, %v921_v15 }
 0x731   :  { %4717 = vmatprep.mubr.msk.f32.mxu1 %vm5133_vm1, %v5132_v3 }
 0x785   :  { %v1180_v17 = vpop.xlane.xlu0 %1179 }
 0x786   :  { %5072 = vrcp.f32 %v1180_v17 }
 0x789   :  { %v1183_v19 = vpop.xlane.xlu0 %1182 }
 0x78a   :  { %5074 = vrcp.f32 %v1183_v19 }
 0x78d   :  { %v1189_v20 = vpop.permute.xlu0 %1188 }
 0x78e   :  { %4716 = vmatpush3.msra.mxu1 %v1189_v20 }
 0x78f   :  { %4892 = vmatprep.subr.bf16.mxu1 %v4891_v39 }
 0x790   :  { %v5073_v21 = vpop.eup %5072 }
 0x791   :  { %v1186_v22 = vmul.f32 %v5073_v21, %v5069_v11  ;;  %v1426_v27 = vpop.permute.xlu0 %1425 }
 0x793   :  { %4718 = vmatmul.mubr.msk.f32.vlgmr.msra.gmra.mrb[10].mxu1 %vm339_vm3, %v1186_v22 }
 0x794   :  { %v5075_v23 = vpop.eup %5074  ;;  %4894 = vmatpush3.bf16.msra.mxu1 %v4891_v39 }
 0x795   :  { %v1187_v24 = vmul.f32 %v5075_v23, %v5071_v13  ;;  %4737 = vmatprep.subr.mxu1 %v5132_v3  ;;  %v1504_v33 = vpop.permute.xlu0 %1503 }
 0x797   :  { %4723 = vmatmul.mubr.msk.f32.vlgmr.msra.gmra.mrb[16].mxu0 %vm339_vm3, %v1187_v24  ;;  %v1886_v24 = vld [vmem:[%s6100_s7 + $0x8] sm:$0xff] }
 0x798   :  { %4733 = vmatpush3.xpose.msk.msra.mxu0 %vm185_vm2, %v1426_v27  ;;  %4734 = vmatprep.mubr.msk.f32.mxu0 %vm5133_vm1, %v5132_v3  ;;  %v1888_v27 = vld [vmem:[%s6100_s7 + $0x18] sm:$0xff] }
 0x799   :  { %4742 = vmatprep.subr.mxu0 %v5132_v3  ;;  %v1502_v38 = vpop.permute.xlu0 %1501 }
 0x79b   :  { %4735 = vmatmul.mubr.msk.f32.vlgmr.msra.gmra.mrb[18].mxu0 %vm185_vm2, %v1424_v28  ;;  %v4899_v28 = vpack.c.bf16 %v1888_v27, %v1886_v24  ;;  %v2028_v24 = vld [vmem:[%s6101_s9 + $0xe0] sm:$0xff]  ;;  %v2029_v27 = vld [vmem:[%s6101_s9 + $0xe8] sm:$0xff] }
 0x79c   :  { %4744 = vmatprep.mubr.msk.f32.mxu0 %vm5133_vm1, %v5132_v3 }
 0x866   :  { %v1260_v30 = vpop.f32.mrb[10].mxu1 }
 0x867   :  { %v4719_v32 = vpop.f32.mrb[11].mxu1  ;;  %4729 = vmatprep.mubr.msk.f32.mxu1 %vm185_vm2, %v1260_v30  ;;  %v1885_v30 = vld [vmem:[%s6100_s7] sm:$0xff] }
 0x868   :  { %v1887_v32 = vld [vmem:[%s6100_s7 + $0x10] sm:$0xff] }
 0x86a   :  { %v1336_v34 = vpop.f32.mrb[16].mxu0 }
 0x86b   :  { %v4724_v36 = vpop.f32.mrb[17].mxu0  ;;  %4730 = vmatmul.mubr.msk.f32.vlgmr.msra.gmra.mrb[4].mxu1 %vm185_vm2, %v1336_v34  ;;  %v1890_v34 = vld [vmem:[%s6100_s7 + $0x28] sm:$0xff] }
 0x86c   :  { %4738 = vmatpush3.xpose.msk.msra.mxu1 %vm185_vm2, %v1504_v33  ;;  %4739 = vmatprep.mubr.msk.f32.mxu1 %vm5133_vm1, %v5132_v3  ;;  %v4901_v33 = vpack.c.bf16 %v1887_v32, %v1885_v30  ;;  %v1892_v36 = vld [vmem:[%s6100_s7 + $0x38] sm:$0xff]  ;;  %v4939_v30 = vpack.c.bf16 %v2029_v27, %v2028_v24 }
 0x86d   :  { %4747 = vmatprep.subr.mxu1 %v5132_v3 }
 0x86e   :  { %v1497_v40 = vpop.f32.mrb[18].mxu0 }
 0x86f   :  { %v1579_v42 = vmul.f32 0.25, %v1497_v40  ;;  %v4736_v43 = vpop.f32.mrb[19].mxu0  ;;  %4740 = vmatmul.mubr.msk.f32.vlgmr.msra.gmra.mrb[12].mxu1 %vm185_vm2, %v1502_v38  ;;  %v4903_v38 = vpack.c.bf16 %v1892_v36, %v1890_v34  ;;  %v1889_v40 = vld [vmem:[%s6100_s7 + $0x20] sm:$0xff] }
 0x870   :  { %4749 = vmatprep.mubr.msk.f32.mxu1 %vm5133_vm1, %v5132_v3 }
 0x871   :  { %v1581_v44 = vsel %vm339_vm3, %v1579_v42, -inf }
 0x872   :  { %1582 = vmax.xlane.f32.xlu1 %v1581_v44  ;;  %v1894_v44 = vld [vmem:[%s6100_s7 + $0x48] sm:$0xff] }
 0x8ff   :  { %v1583_v45 = vpop.xlane.xlu1 %1582 }
 0x900   :  { %v1587_v46 = vsub.f32 %v1579_v42, %v1583_v45  ;;  %v1891_v42 = vld [vmem:[%s6100_s7 + $0x30] sm:$0xff]  ;;  %v1896_v45 = vld [vmem:[%s6100_s7 + $0x58] sm:$0xff] }
 0x901   :  { %v4905_v43 = vpack.c.bf16 %v1891_v42, %v1889_v40 }
 0x902   :  { %v1589_v47 = vmul.f32 1.442695, %v1587_v46  ;;  %v4907_v46 = vpack.c.bf16 %v1896_v45, %v1894_v44  ;;  %v4348_v44 = vld [vmem:[%s6102_s5] ss:$0 sm:$0xff] }
 0x904   :  { %5076 = vpow2.f32 %v1589_v47  ;;  %v1893_v47 = vld [vmem:[%s6100_s7 + $0x40] sm:$0xff] }
 0x90e   :  { %v5077_v52 = vpop.eup %5076 }
 0x90f   :  { %v1593_v53 = vsel %vm339_vm3, %v5077_v52, 0.0 }
 0x942   :  { %v1575_v48 = vpop.f32.mrb[12].mxu1 }
 0x943   :  { %v1580_v49 = vmul.f32 0.25, %v1575_v48  ;;  %v4741_v50 = vpop.f32.mrb[13].mxu1  ;;  %v1895_v48 = vld [vmem:[%s6100_s7 + $0x50] sm:$0xff] }
 0x944   :  { %v1898_v50 = vld [vmem:[%s6100_s7 + $0x68] sm:$0xff] }
 0x945   :  { %v1584_v51 = vsel %vm339_vm3, %v1580_v49, -inf }
 0x946   :  { %1585 = vmax.xlane.f32.xlu0 %v1584_v51  ;;  %v1900_v51 = vld [vmem:[%s6100_s7 + $0x78] sm:$0xff] }
 0x94a   :  { %1594 = vadd.xlane.f32.xlu0 %v1593_v53  ;;  %v4911_v53 = vpack.c.bf16 %v1900_v51, %v1898_v50 }
 0x960   :  { %1603 = vrot.lane.b32.xlu0 %v5302_v37, %s6111_s19  ;;  %v172_v37 = vld [vmem:[%s6098_s3 + $0x30] sm:$0xff] }
 0x961   :  { %v4895_v1 = vpack.c.bf16 %v173_v63, %v172_v37 }
 0x9d3   :  { %v1586_v54 = vpop.xlane.xlu0 %1585 }
 0x9d4   :  { %v1588_v55 = vsub.f32 %v1580_v49, %v1586_v54  ;;  %v4909_v49 = vpack.c.bf16 %v1895_v48, %v1893_v47  ;;  %v1899_v54 = vld [vmem:[%s6100_s7 + $0x70] sm:$0xff]  ;;  %v4349_v47 = vld [vmem:[%s6103_s6] ss:$0 sm:$0xff] }
 0x9d6   :  { %v1591_v56 = vmul.f32 1.442695, %v1588_v55 }
 0x9d7   :  { %v1595_v57 = vpop.xlane.xlu0 %1594 }
 0x9d8   :  { %5078 = vpow2.f32 %v1591_v56  ;;  %v2016_v56 = vld [vmem:[%s6101_s9 + $0x80] sm:$0xff] }
 0x9d9   :  { %5080 = vrcp.f32 %v1595_v57  ;;  %v2017_v57 = vld [vmem:[%s6101_s9 + $0x88] sm:$0xff] }
 0x9db   :  { %v1604_v58 = vpop.permute.xlu0 %1603 }
 0x9dc   :  { %4743 = vmatpush3.msra.mxu0 %v1604_v58  ;;  %v2000_v58 = vld [vmem:[%s6101_s9] sm:$0xff] }
 0x9dd   :  { %4900 = vmatprep.subr.bf16.mxu0 %v4899_v28 }
 0x9e2   :  { %v5079_v59 = vpop.eup %5078 }
 0x9e3   :  { %v5081_v60 = vpop.eup %5080  ;;  %v1596_v61 = vsel %vm339_vm3, %v5079_v59, 0.0 }
 0x9e4   :  { %v1601_v62 = vmul.f32 %v5081_v60, %v5077_v52  ;;  %1597 = vadd.xlane.f32.xlu1 %v1596_v61  ;;  %v1897_v52 = vld [vmem:[%s6100_s7 + $0x60] sm:$0xff]  ;;  %v2001_v60 = vld [vmem:[%s6101_s9 + $0x8] sm:$0xff]  ;;  %v2018_v61 = vld [vmem:[%s6101_s9 + $0x90] sm:$0xff] }
 0x9e5   :  { %v4913_v55 = vpack.c.bf16 %v1899_v54, %v1897_v52  ;;  %v4917_v37 = vpack.c.bf16 %v2001_v60, %v2000_v58  ;;  %v2031_v54 = vld [vmem:[%s6101_s9 + $0xf8] sm:$0xff] }
 0x9e6   :  { %4745 = vmatmul.mubr.msk.f32.vlgmr.msra.gmra.mrb[20].mxu0 %vm339_vm3, %v1601_v62  ;;  %v2019_v62 = vld [vmem:[%s6101_s9 + $0x98] sm:$0xff] }
 0x9e7   :  { %1983 = vmatprep.mubr.f32.mxu0 %v5132_v3  ;;  %4902 = vmatpush1.bf16.msra.mxu0 %v4901_v33  ;;  %v4919_v63 = vpack.c.bf16 %v2019_v62, %v2018_v61 }
 0x9e8   :  { %4904 = vmatprep.subr.bf16.mxu0 %v4903_v38 }
 0x9eb   :  { %4906 = vmatpush1.bf16.msra.mxu0 %v4905_v43 }
 0x9ec   :  { %4908 = vmatprep.subr.bf16.mxu0 %v4907_v46 }
 0x9ef   :  { %4910 = vmatpush1.bf16.msra.mxu0 %v4909_v49 }
 0x9f0   :  { %4912 = vmatprep.subr.bf16.mxu0 %v4911_v53  ;;  %v2030_v53 = vld [vmem:[%s6101_s9 + $0xf0] sm:$0xff] }
 0x9f3   :  { %4914 = vmatpush1.bf16.msra.mxu0 %v4913_v55  ;;  %v4943_v55 = vpack.c.bf16 %v2031_v54, %v2030_v53  ;;  %v4368_v54 = vld [vmem:[%s6095_s1 + $0xe8] sm:$0xff] }
 0x9f5   :  { %1679 = vrot.lane.b32.xlu1 %v5310_v41, %s6111_s19 }
 0xa71   :  { %v1598_v0 = vpop.xlane.xlu1 %1597 }
 0xa72   :  { %5082 = vrcp.f32 %v1598_v0  ;;  %v2002_v0 = vld [vmem:[%s6101_s9 + $0x10] sm:$0xff] }
 0xa75   :  { %v1680_v2 = vpop.permute.xlu1 %1679 }
 0xa76   :  { %4748 = vmatpush3.msra.mxu1 %v1680_v2  ;;  %v2020_v2 = vld [vmem:[%s6101_s9 + $0xa0] sm:$0xff] }
 0xa77   :  { %4896 = vmatprep.subr.bf16.mxu1 %v4895_v1 }
 0xa7c   :  { %v5083_v4 = vpop.eup %5082 }
 0xa7d   :  { %v1602_v5 = vmul.f32 %v5083_v4, %v5079_v59  ;;  %v4915_v59 = vpack.c.bf16 %v2017_v57, %v2016_v56  ;;  %v2021_v4 = vld [vmem:[%s6101_s9 + $0xa8] sm:$0xff]  ;;  %v2014_v56 = vld [vmem:[%s6101_s9 + $0x70] sm:$0xff]  ;;  %v2015_v57 = vld [vmem:[%s6101_s9 + $0x78] sm:$0xff] }
 0xa7e   :  { %v4945_v58 = vpack.c.bf16 %v2015_v57, %v2014_v56  ;;  %v4367_v57 = vld [vmem:[%s6095_s1 + $0xe0] sm:$0xff] }
 0xa7f   :  { %4750 = vmatmul.mubr.msk.f32.vlgmr.msra.gmra.mrb[14].mxu1 %vm339_vm3, %v1602_v5 }
 0xa80   :  { %4898 = vmatpush3.bf16.msra.mxu1 %v4895_v1  ;;  %v2003_v1 = vld [vmem:[%s6101_s9 + $0x18] sm:$0xff] }
 0xa81   :  { %4916 = vmatprep.subr.bf16.mxu1 %v4915_v59  ;;  %v4921_v5 = vpack.c.bf16 %v2003_v1, %v2002_v0  ;;  %v1901_v59 = vld [vmem:[%s6104_s8] sm:$0x3] }
 0xa82   :  { %v1906_v60 = vrot.slane %v1901_v59, %v5291_v29  ;;  %v1910_v61 = vrot.slane %v1901_v59, %v5296_v31 }
 0xab9   :  { %v1675_v41 = vpop.f32.mrb[20].mxu0 }
 0xaba   :  { %v4746_v6 = vpop.f32.mrb[21].mxu0  ;;  %4756 = vmatprep.mubr.msk.f32.mxu1 %vm185_vm2, %v1675_v41  ;;  %v4923_v41 = vpack.c.bf16 %v2021_v4, %v2020_v2 }
 0xabb   :  { %v2004_v6 = vld [vmem:[%s6101_s9 + $0x20] sm:$0xff] }
 0xb52   :  { %v1751_v7 = vpop.f32.mrb[14].mxu1 }
 0xb53   :  { %v4751_v8 = vpop.f32.mrb[15].mxu1  ;;  %4757 = vmatmul.mubr.msk.f32.vlgmr.msra.gmra.mrb[4].mxu1 %vm185_vm2, %v1751_v7  ;;  %v2005_v7 = vld [vmem:[%s6101_s9 + $0x28] sm:$0xff] }
 0xb54   :  { %4918 = vmatpush3.bf16.msra.mxu1 %v4917_v37  ;;  %v2022_v8 = vld [vmem:[%s6101_s9 + $0xb0] sm:$0xff] }
 0xb55   :  { %4920 = vmatprep.subr.bf16.mxu1 %v4919_v63 }
 0xb58   :  { %4922 = vmatpush3.bf16.msra.mxu1 %v4921_v5 }
 0xb59   :  { %4924 = vmatprep.subr.bf16.mxu1 %v4923_v41 }
 0xc26   :  { %v4758_v10 = vpop.f32.mrb[4].mxu1 }
 0xc27   :  { %v5027_v11 = vadd.f32 %v4758_v10, %v4315_v9  ;;  %v1827_v12 = vpop.f32.mrb[5].mxu1  ;;  %v4925_v10 = vpack.c.bf16 %v2005_v7, %v2004_v6 }
 0xc28   :  { %v5028_v13 = vadd.f32 %v4315_v9, %v1827_v12  ;;  %v2023_v9 = vld [vmem:[%s6101_s9 + $0xb8] sm:$0xff]  ;;  %v2006_v12 = vld [vmem:[%s6101_s9 + $0x30] sm:$0xff] }
 0xc29   :  { %v1839_v14 = vadd.f32 %v5027_v11, %v5283_v26  ;;  %v4927_v11 = vpack.c.bf16 %v2023_v9, %v2022_v8  ;;  %4926 = vmatpush3.bf16.msra.mxu1 %v4925_v10  ;;  %v4352_v10 = vld [vmem:[%s6105_s10] ss:$0 sm:$0xff] }
 0xc2a   :  { %v1838_v15 = vadd.f32 %v5028_v13, %v5274_v25  ;;  %v2007_v13 = vld [vmem:[%s6101_s9 + $0x38] sm:$0xff] }
 0xc2b   :  { %v1845_v16 = vsel %vm82_vm0, %v1839_v14, 0.0  ;;  %4928 = vmatprep.subr.bf16.mxu1 %v4927_v11 }
 0xc2c   :  { %1846 = vadd.xlane.f32.xlu0 %v1845_v16  ;;  %v1842_v17 = vsel %vm82_vm0, %v1838_v15, 0.0  ;;  %v4929_v16 = vpack.c.bf16 %v2007_v13, %v2006_v12 }
 0xc2d   :  { %1843 = vadd.xlane.f32.xlu1 %v1842_v17 }
 0xc2e   :  { %4930 = vmatpush3.bf16.msra.mxu1 %v4929_v16 }
 0xcb9   :  { %v1847_v18 = vpop.xlane.xlu0 %1846 }
 0xcba   :  { %v1850_v35 = vmul.f32 0.015625, %v1847_v18  ;;  %v1844_v19 = vpop.xlane.xlu1 %1843  ;;  %v2008_v18 = vld [vmem:[%s6101_s9 + $0x40] sm:$0xff] }
 0xcbb   :  { %v1849_v39 = vmul.f32 0.015625, %v1844_v19  ;;  %v2026_v19 = vld [vmem:[%s6101_s9 + $0xd0] sm:$0xff] }
 0xcbc   :  { %v5474_v20 = vsub.f32 %v1839_v14, %v1850_v35  ;;  %v2024_v14 = vld [vmem:[%s6101_s9 + $0xc0] sm:$0xff]  ;;  %v2009_v35 = vld [vmem:[%s6101_s9 + $0x48] sm:$0xff] }
 0xcbd   :  { %v5476_v21 = vsub.f32 %v1838_v15, %v1849_v39  ;;  %v2025_v15 = vld [vmem:[%s6101_s9 + $0xc8] sm:$0xff]  ;;  %v2027_v39 = vld [vmem:[%s6101_s9 + $0xd8] sm:$0xff] }
 0xcbe   :  { %v1854_v22 = vmul.f32 %v5474_v20, %v5474_v20  ;;  %v4931_v17 = vpack.c.bf16 %v2025_v15, %v2024_v14 }
 0xcbf   :  { %v1853_v25 = vmul.f32 %v5476_v21, %v5476_v21 }
 0xcc0   :  { %v1858_v26 = vsel %vm82_vm0, %v1854_v22, 0.0  ;;  %v4933_v22 = vpack.c.bf16 %v2009_v35, %v2008_v18  ;;  %4932 = vmatprep.subr.bf16.mxu1 %v4931_v17 }
 0xcc1   :  { %1859 = vadd.xlane.f32.xlu1 %v1858_v26  ;;  %v1855_v23 = vsel %vm82_vm0, %v1853_v25, 0.0  ;;  %v4935_v25 = vpack.c.bf16 %v2027_v39, %v2026_v19  ;;  %v2010_v26 = vld [vmem:[%s6101_s9 + $0x50] sm:$0xff] }
 0xcc2   :  { %1856 = vadd.xlane.f32.xlu0 %v1855_v23  ;;  %v2011_v23 = vld [vmem:[%s6101_s9 + $0x58] sm:$0xff]  ;;  %4934 = vmatpush3.bf16.msra.mxu1 %v4933_v22 }
 0xcc3   :  { %v4937_v28 = vpack.c.bf16 %v2011_v23, %v2010_v26  ;;  %4936 = vmatprep.subr.bf16.mxu1 %v4935_v25 }
 0xcc6   :  { %4938 = vmatpush3.bf16.msra.mxu1 %v4937_v28 }
 0xcc7   :  { %4940 = vmatprep.subr.bf16.mxu1 %v4939_v30 }
 0xd4e   :  { %v1860_v32 = vpop.xlane.xlu1 %1859 }
 0xd4f   :  { %v1862_v33 = vmul.f32 0.015625, %v1860_v32  ;;  %v1857_v34 = vpop.xlane.xlu0 %1856 }
 0xd50   :  { %v1861_v36 = vmul.f32 0.015625, %v1857_v34  ;;  %v4356_v34 = vld [vmem:[%s6095_s1 + $0x88] sm:$0xff] }
 0xd51   :  { %v1864_v38 = vadd.f32 1e-05, %v1862_v33 }
 0xd52   :  { %v1863_v40 = vadd.f32 1e-05, %v1861_v36  ;;  %v4358_v36 = vld [vmem:[%s6095_s1 + $0x98] sm:$0xff] }
 0xd53   :  { %5084 = vrsqrt.f32 %v1864_v38  ;;  %v4947_v38 = vpack.c.bf16 %v4358_v36, %v4356_v34 }
 0xd54   :  { %5086 = vrsqrt.f32 %v1863_v40  ;;  %v4355_v40 = vld [vmem:[%s6095_s1 + $0x80] sm:$0xff] }
 0xd55   :  { %4948 = vmatprep.subr.bf16.mxu0 %v4947_v38 }
 0xd5d   :  { %v5085_v42 = vpop.eup %5084 }
 0xd5e   :  { %v5087_v43 = vpop.eup %5086  ;;  %v1868_v46 = vmul.f32 %v5085_v42, %v5474_v20  ;;  %v2012_v20 = vld [vmem:[%s6101_s9 + $0x60] sm:$0xff]  ;;  %v4357_v42 = vld [vmem:[%s6095_s1 + $0x90] sm:$0xff] }
 0xd5f   :  { %v1867_v45 = vmul.f32 %v5087_v43, %v5476_v21  ;;  %v2013_v21 = vld [vmem:[%s6101_s9 + $0x68] sm:$0xff]  ;;  %v4949_v43 = vpack.c.bf16 %v4357_v42, %v4355_v40 }
 0xd60   :  { %v1876_v50 = vmul.f32 %v4348_v44, %v1868_v46  ;;  %v4941_v52 = vpack.c.bf16 %v2013_v21, %v2012_v20  ;;  %v4363_v21 = vld [vmem:[%s6095_s1 + $0xc0] sm:$0xff] }
 0xd61   :  { %v1875_v48 = vmul.f32 %v4348_v44, %v1867_v45  ;;  %v4360_v44 = vld [vmem:[%s6095_s1 + $0xa8] sm:$0xff]  ;;  %v4362_v45 = vld [vmem:[%s6095_s1 + $0xb8] sm:$0xff] }
 0xd62   :  { %v1884_v51 = vadd.f32 %v4349_v47, %v1876_v50  ;;  %4942 = vmatpush3.bf16.msra.mxu1 %v4941_v52  ;;  %v4951_v46 = vpack.c.bf16 %v4362_v45, %v4360_v44  ;;  %v4364_v50 = vld [vmem:[%s6095_s1 + $0xc8] sm:$0xff]  ;;  %v4365_v52 = vld [vmem:[%s6095_s1 + $0xd0] sm:$0xff] }
 0xd63   :  { %v1883_v49 = vadd.f32 %v4349_v47, %v1875_v48  ;;  %4944 = vmatprep.subr.bf16.mxu1 %v4943_v55  ;;  %v4359_v47 = vld [vmem:[%s6095_s1 + $0xa0] sm:$0xff]  ;;  %v4361_v48 = vld [vmem:[%s6095_s1 + $0xb0] sm:$0xff]  ;;  %v4957_v53 = vpack.c.bf16 %v4365_v52, %v4363_v21  ;;  %v4370_v55 = vld [vmem:[%s6095_s1 + $0xf8] sm:$0xff] }
 0xd64   :  { %v4959_v56 = vpack.c.bf16 %v4370_v55, %v4368_v54 }
 0xd65   :  { %4350 = vmatmul.mubr.msk.f32.vlgmr.msra.gmra.mrb[22].mxu0 %vm82_vm0, %v1883_v49 }
 0xd66   :  { %1989 = vmatprep.mubr.f32.mxu0 %v5132_v3  ;;  %4946 = vmatpush3.bf16.msra.mxu1 %v4945_v58  ;;  %v4369_v58 = vld [vmem:[%s6095_s1 + $0xf0] sm:$0xff] }
 0xd67   :  { %4769 = vmatprep.subr.mxu1 %v5132_v3  ;;  %4950 = vmatpush1.bf16.msra.mxu0 %v4949_v43  ;;  %v4961_v59 = vpack.c.bf16 %v4369_v58, %v4367_v57 }
 0xd68   :  { %4952 = vmatprep.subr.bf16.mxu0 %v4951_v46 }
 0xd69   :  { %4351 = vmatmul.mubr.msk.f32.gmra.mrb[24].mxu0 %vm82_vm0, %v1884_v51 }
 0xd6a   :  { %2260 = vmatprep.mubr.f32.mxu0 %v5132_v3 }
 0xe38   :  { %v1985_v62 = vpop.f32.mrb[22].mxu0 }
 0xe39   :  { %v1986_v37 = vadd.f32 %v1985_v62, %v1906_v60  ;;  %v1987_v63 = vpop.f32.mrb[23].mxu0 }
 0xe3a   :  { %v1988_v0 = vadd.f32 %v1987_v63, %v1910_v61 }
 0xe3b   :  { %v1996_v4 = vmax.f32 %v1986_v37, 0.0 }
 0xe3c   :  { %v1997_v1 = vmax.f32 %v1988_v0, 0.0  ;;  %v1991_v2 = vpop.f32.mrb[24].mxu0 }
 0xe3d   :  { %v1992_v5 = vadd.f32 %v1991_v2, %v1906_v60  ;;  %v1993_v41 = vpop.f32.mrb[25].mxu0  ;;  %v4353_v2 = vld [vmem:[%s6106_s11] ss:$0 sm:$0xff] }
 0xe3e   :  { %v1994_v6 = vadd.f32 %v1993_v41, %v1910_v61  ;;  %2103 = vmatprep.mubr.f32.mxu1 %v1997_v1 }
 0xe3f   :  { %2104 = vmatmul.mubr.f32.vlgmr.msra.gmra.mrb[16].mxu1 %v1996_v4  ;;  %v1998_v8 = vmax.f32 %v1992_v5, 0.0  ;;  %v4354_v5 = vld [vmem:[%s6107_s12] ss:$0 sm:$0xff] }
 0xe40   :  { %v1999_v7 = vmax.f32 %v1994_v6, 0.0 }
 0xe42   :  { %2108 = vmatprep.mubr.f32.mxu1 %v1999_v7 }
 0xe43   :  { %2109 = vmatmul.mubr.f32.gmra.mrb[18].mxu1 %v1998_v8 }
 0xe44   :  { %4771 = vmatprep.mubr.msk.f32.mxu1 %vm5133_vm1, %v5132_v3 }
 0xf12   :  { %v4559_v9 = vpop.f32.mrb[16].mxu1 }
 0xf13   :  { %v4560_v11 = vpop.f32.mrb[17].mxu1 }
 0xf14   :  { %v4561_v12 = vadd.f32 %v4560_v11, %v4559_v9  ;;  %v4371_v11 = vld [vmem:[%s6097_s2 + $0x2] sm:$0x3] }
 0xf16   :  { %v2106_v13 = vadd.f32 %v4561_v12, %v4352_v10  ;;  %v4562_v14 = vpop.f32.mrb[18].mxu1  ;;  %v2183_v12 = vrot.slane %v4371_v11, %v5291_v29 }
 0xf17   :  { %v4563_v15 = vpop.f32.mrb[19].mxu1 }
 0xf18   :  { %v4564_v16 = vadd.f32 %v4563_v15, %v4562_v14  ;;  %v2114_v17 = vadd.f32 %v2106_v13, %v1883_v49  ;;  %v4953_v49 = vpack.c.bf16 %v4361_v48, %v4359_v47  ;;  %v2187_v13 = vrot.slane %v4371_v11, %v5296_v31  ;;  %v4374_v48 = vld [vmem:[%s6098_s3 + $0x40] sm:$0xff] }
 0xf1a   :  { %v2111_v18 = vadd.f32 %v4564_v16, %v4352_v10  ;;  %v2118_v35 = vsel %vm82_vm0, %v2114_v17, 0.0  ;;  %4954 = vmatpush1.bf16.msra.mxu0 %v4953_v49  ;;  %v4375_v49 = vld [vmem:[%s6098_s3 + $0x48] sm:$0xff] }
 0xf1b   :  { %2119 = vadd.xlane.f32.xlu0 %v2118_v35 }
 0xf1c   :  { %v2115_v19 = vadd.f32 %v2111_v18, %v1884_v51  ;;  %v4366_v51 = vld [vmem:[%s6095_s1 + $0xd8] sm:$0xff] }
 0xf1d   :  { %v4955_v20 = vpack.c.bf16 %v4366_v51, %v4364_v50  ;;  %v4963_v50 = vpack.c.bf16 %v4375_v49, %v4374_v48  ;;  %v4376_v48 = vld [vmem:[%s6098_s3 + $0x50] sm:$0xff]  ;;  %v4377_v49 = vld [vmem:[%s6098_s3 + $0x58] sm:$0xff] }
 0xf1e   :  { %v2121_v39 = vsel %vm82_vm0, %v2115_v19, 0.0 }
 0xf1f   :  { %2122 = vadd.xlane.f32.xlu1 %v2121_v39  ;;  %4956 = vmatprep.subr.bf16.mxu0 %v4955_v20 }
 0xf20   :  { %4958 = vmatpush1.bf16.msra.mxu0 %v4957_v53 }
 0xf21   :  { %4960 = vmatprep.subr.bf16.mxu0 %v4959_v56 }
 0xf24   :  { %4962 = vmatpush1.bf16.msra.mxu0 %v4961_v59 }
 0xf25   :  { %4759 = vmatprep.subr.mxu0 %v5132_v3 }
 0xfa8   :  { %v2120_v22 = vpop.xlane.xlu0 %2119 }
 0xfa9   :  { %v2124_v25 = vmul.f32 0.015625, %v2120_v22 }
 0xfab   :  { %v2126_v26 = vsub.f32 %v2114_v17, %v2124_v25 }
 0xfac   :  { %v2123_v23 = vpop.xlane.xlu1 %2122 }
 0xfad   :  { %v2125_v24 = vmul.f32 0.015625, %v2123_v23  ;;  %v2128_v27 = vmul.f32 %v2126_v26, %v2126_v26 }
 0xfaf   :  { %v2127_v28 = vsub.f32 %v2115_v19, %v2125_v24  ;;  %v2130_v30 = vsel %vm82_vm0, %v2128_v27, 0.0 }
 0xfb0   :  { %2131 = vadd.xlane.f32.xlu0 %v2130_v30 }
 0xfb1   :  { %v2129_v32 = vmul.f32 %v2127_v28, %v2127_v28 }
 0xfb3   :  { %v2133_v33 = vsel %vm82_vm0, %v2129_v32, 0.0 }
 0xfb4   :  { %2134 = vadd.xlane.f32.xlu1 %v2133_v33 }
0x103d   :  { %v2132_v60 = vpop.xlane.xlu0 %2131 }
0x103e   :  { %v2136_v61 = vmul.f32 0.015625, %v2132_v60 }
0x1040   :  { %v2138_v62 = vadd.f32 1e-05, %v2136_v61 }
0x1041   :  { %v2135_v37 = vpop.xlane.xlu1 %2134 }
0x1042   :  { %5088 = vrsqrt.f32 %v2138_v62  ;;  %v2137_v63 = vmul.f32 0.015625, %v2135_v37 }
0x1044   :  { %v2139_v0 = vadd.f32 1e-05, %v2137_v63 }
0x1046   :  { %5090 = vrsqrt.f32 %v2139_v0 }
0x104c   :  { %v5089_v1 = vpop.eup %5088 }
0x104d   :  { %v2142_v4 = vmul.f32 %v5089_v1, %v2126_v26 }
0x104f   :  { %v2150_v41 = vmul.f32 %v4353_v2, %v2142_v4 }
0x1050   :  { %v5091_v6 = vpop.eup %5090 }
0x1051   :  { %v5710_v7 = vadd.f32 %v4354_v5, %v2150_v41  ;;  %v2143_v8 = vmul.f32 %v5091_v6, %v2127_v28 }
0x1053   :  { %4372 = vmatmul.mubr.msk.f32.vlgmr.msra.gmra.mrb[26].mxu0 %vm82_vm0, %v5710_v7  ;;  %v2151_v9 = vmul.f32 %v4353_v2, %v2143_v8 }
0x1054   :  { %2266 = vmatprep.mubr.f32.mxu0 %v5132_v3 }
0x1055   :  { %v5715_v10 = vadd.f32 %v4354_v5, %v2151_v9 }
0x1057   :  { %4373 = vmatmul.mubr.msk.f32.gmra.mrb[28].mxu0 %vm82_vm0, %v5715_v10 }
0x1058   :  { %4761 = vmatprep.mubr.msk.f32.mxu0 %vm5133_vm1, %v5132_v3 }
0x1126   :  { %v2262_v14 = vpop.f32.mrb[26].mxu0 }
0x1127   :  { %v5726_v15 = vadd.f32 %v2262_v14, %v2183_v12  ;;  %v2264_v16 = vpop.f32.mrb[27].mxu0 }
0x1128   :  { %v5728_v17 = vadd.f32 %v2264_v16, %v2187_v13 }
0x1129   :  { %2292 = vrot.lane.b32.xlu0 %v5726_v15, %s5134_s0 }
0x112a   :  { %v2268_v18 = vpop.f32.mrb[28].mxu0  ;;  %4770 = vmatpush3.msra.mxu1 %v5728_v17 }
0x112b   :  { %v5733_v35 = vadd.f32 %v2268_v18, %v2183_v12  ;;  %v2270_v19 = vpop.f32.mrb[29].mxu0  ;;  %4964 = vmatprep.subr.bf16.mxu1 %v4963_v50 }
0x112c   :  { %v5735_v39 = vadd.f32 %v2270_v19, %v2187_v13 }
0x112d   :  { %2369 = vrot.lane.b32.xlu1 %v5733_v35, %s5134_s0 }
0x119b   :  { %v2293_v22 = vpop.permute.xlu0 %2292 }
0x119c   :  { %4760 = vmatpush3.xpose.msk.msra.mxu0 %vm185_vm2, %v2293_v22 }
0x119d   :  { %4764 = vmatprep.subr.mxu0 %v5132_v3 }
0x119f   :  { %4762 = vmatmul.mubr.msk.f32.vlgmr.msra.gmra.mrb[30].mxu0 %vm185_vm2, %v5726_v15  ;;  %v2370_v25 = vpop.permute.xlu1 %2369 }
0x11a0   :  { %4765 = vmatpush3.xpose.msk.msra.mxu0 %vm185_vm2, %v2370_v25  ;;  %4766 = vmatprep.mubr.msk.f32.mxu0 %vm5133_vm1, %v5132_v3 }
0x11a1   :  { %4774 = vmatprep.subr.mxu0 %v5132_v3 }
0x11a3   :  { %4767 = vmatmul.mubr.msk.f32.vlgmr.msra.gmra.mrb[32].mxu0 %vm185_vm2, %v5733_v35 }
0x11a4   :  { %4775 = vmatpush3.msra.mxu0 %v5735_v39  ;;  %4776 = vmatprep.mubr.msk.f32.mxu0 %vm5133_vm1, %v5132_v3 }
0x11a5   :  { %4786 = vmatprep.subr.mxu0 %v5132_v3 }
0x1272   :  { %v2364_v26 = vpop.f32.mrb[30].mxu0 }
0x1273   :  { %v2445_v23 = vmul.f32 0.25, %v2364_v26  ;;  %v4763_v24 = vpop.f32.mrb[31].mxu0 }
0x1275   :  { %v2447_v27 = vsel %vm339_vm3, %v2445_v23, -inf }
0x1276   :  { %2448 = vmax.xlane.f32.xlu1 %v2447_v27  ;;  %v2441_v28 = vpop.f32.mrb[32].mxu0 }
0x1277   :  { %v2446_v30 = vmul.f32 0.25, %v2441_v28  ;;  %v4768_v32 = vpop.f32.mrb[33].mxu0 }
0x1279   :  { %v2450_v33 = vsel %vm339_vm3, %v2446_v30, -inf }
0x127a   :  { %2451 = vmax.xlane.f32.xlu0 %v2450_v33 }
0x1303   :  { %v2449_v34 = vpop.xlane.xlu1 %2448 }
0x1304   :  { %v2453_v36 = vsub.f32 %v2445_v23, %v2449_v34 }
0x1306   :  { %v2455_v38 = vmul.f32 1.442695, %v2453_v36 }
0x1307   :  { %v2452_v40 = vpop.xlane.xlu0 %2451 }
0x1308   :  { %5092 = vpow2.f32 %v2455_v38  ;;  %v2454_v42 = vsub.f32 %v2446_v30, %v2452_v40 }
0x130a   :  { %v2457_v43 = vmul.f32 1.442695, %v2454_v42 }
0x130c   :  { %5094 = vpow2.f32 %v2457_v43 }
0x1312   :  { %v5093_v44 = vpop.eup %5092 }
0x1313   :  { %v2459_v45 = vsel %vm339_vm3, %v5093_v44, 0.0 }
0x1314   :  { %2460 = vadd.xlane.f32.xlu0 %v2459_v45 }
0x1316   :  { %v5095_v46 = vpop.eup %5094 }
0x1317   :  { %v2462_v47 = vsel %vm339_vm3, %v5095_v46, 0.0 }
0x1318   :  { %2463 = vadd.xlane.f32.xlu1 %v2462_v47 }
0x1329   :  { %2698 = vrot.lane.b32.xlu1 %v5726_v15, %s5136_s27 }
0x132a   :  { %2700 = vrot.lane.b32.xlu0 %v5726_v15, %s5135_s26 }
0x132d   :  { %2778 = vrot.lane.b32.xlu1 %v5733_v35, %s5135_s26  ;;  %s6115_s26 = smov 16  }
0x132e   :  { %2776 = vrot.lane.b32.xlu0 %v5733_v35, %s5136_s27 }
0x13a1   :  { %v2461_v51 = vpop.xlane.xlu0 %2460 }
0x13a2   :  { %5096 = vrcp.f32 %v2461_v51 }
0x13a5   :  { %v2464_v20 = vpop.xlane.xlu1 %2463  ;;  %v2701_v55 = vpop.permute.xlu0 %2700 }
0x13a6   :  { %5098 = vrcp.f32 %v2464_v20 }
0x13a9   :  { %v2699_v56 = vpop.permute.xlu1 %2698  ;;  %v2777_v62 = vpop.permute.xlu0 %2776 }
0x13ac   :  { %v5097_v21 = vpop.eup %5096 }
0x13ad   :  { %v2467_v52 = vmul.f32 %v5097_v21, %v5093_v44  ;;  %v2779_v60 = vpop.permute.xlu1 %2778 }
0x13af   :  { %4772 = vmatmul.mubr.msk.f32.vlgmr.msra.gmra.mrb[20].mxu1 %vm339_vm3, %v2467_v52 }
0x13b0   :  { %v5099_v53 = vpop.eup %5098  ;;  %4966 = vmatpush3.bf16.msra.mxu1 %v4963_v50  ;;  %v4967_v50 = vpack.c.bf16 %v4377_v49, %v4376_v48 }
0x13b1   :  { %v2468_v54 = vmul.f32 %v5099_v53, %v5095_v46  ;;  %4791 = vmatprep.subr.mxu1 %v5132_v3 }
0x13b3   :  { %4777 = vmatmul.mubr.msk.f32.vlgmr.msra.gmra.mrb[34].mxu0 %vm339_vm3, %v2468_v54 }
0x13b4   :  { %4787 = vmatpush3.xpose.msk.msra.mxu0 %vm185_vm2, %v2701_v55  ;;  %4788 = vmatprep.mubr.msk.f32.mxu0 %vm5133_vm1, %v5132_v3 }
0x13b5   :  { %4796 = vmatprep.subr.mxu0 %v5132_v3 }
0x13b7   :  { %4789 = vmatmul.mubr.msk.f32.vlgmr.msra.gmra.mrb[36].mxu0 %vm185_vm2, %v2699_v56 }
0x13b8   :  { %4798 = vmatprep.mubr.msk.f32.mxu0 %vm5133_vm1, %v5132_v3 }
0x1482   :  { %v2538_v57 = vpop.f32.mrb[20].mxu1 }
0x1483   :  { %v4773_v58 = vpop.f32.mrb[21].mxu1  ;;  %4783 = vmatprep.mubr.msk.f32.mxu1 %vm185_vm2, %v2538_v57 }
0x1486   :  { %v2611_v59 = vpop.f32.mrb[34].mxu0 }
0x1487   :  { %v4778_v61 = vpop.f32.mrb[35].mxu0  ;;  %4784 = vmatmul.mubr.msk.f32.vlgmr.msra.gmra.mrb[22].mxu1 %vm185_vm2, %v2611_v59  ;;  %v4378_v59 = vld [vmem:[%s6098_s3 + $0x60] sm:$0xff] }
0x1488   :  { %4792 = vmatpush3.xpose.msk.msra.mxu1 %vm185_vm2, %v2779_v60  ;;  %4793 = vmatprep.mubr.msk.f32.mxu1 %vm5133_vm1, %v5132_v3  ;;  %v4379_v60 = vld [vmem:[%s6098_s3 + $0x68] sm:$0xff] }
0x1489   :  { %4801 = vmatprep.subr.mxu1 %v5132_v3  ;;  %v4971_v61 = vpack.c.bf16 %v4379_v60, %v4378_v59 }
0x148a   :  { %v2772_v37 = vpop.f32.mrb[36].mxu0 }
0x148b   :  { %v2854_v63 = vmul.f32 0.25, %v2772_v37  ;;  %v4790_v0 = vpop.f32.mrb[37].mxu0  ;;  %4794 = vmatmul.mubr.msk.f32.vlgmr.msra.gmra.mrb[24].mxu1 %vm185_vm2, %v2777_v62 }
0x148c   :  { %4803 = vmatprep.mubr.msk.f32.mxu1 %vm5133_vm1, %v5132_v3 }
0x148d   :  { %v2856_v1 = vsel %vm339_vm3, %v2854_v63, -inf }
0x148e   :  { %2857 = vmax.xlane.f32.xlu1 %v2856_v1 }
0x149f   :  { %3117 = vrot.lane.b32.xlu1 %v5726_v15, %s5137_s17 }
0x14a3   :  { %3115 = vrot.lane.b32.xlu1 %v5726_v15, %s5138_s18 }
0x14a7   :  { %3193 = vrot.lane.b32.xlu1 %v5733_v35, %s5138_s18 }
0x151b   :  { %v2858_v2 = vpop.xlane.xlu1 %2857 }
0x151c   :  { %v2862_v4 = vsub.f32 %v2854_v63, %v2858_v2 }
0x151e   :  { %v2864_v5 = vmul.f32 1.442695, %v2862_v4 }
0x151f   :  { %v3118_v16 = vpop.permute.xlu1 %3117 }
0x1520   :  { %5100 = vpow2.f32 %v2864_v5 }
0x1523   :  { %v3116_v22 = vpop.permute.xlu1 %3115 }
0x152a   :  { %v5101_v41 = vpop.eup %5100 }
0x152b   :  { %v2868_v6 = vsel %vm339_vm3, %v5101_v41, 0.0 }
0x152c   :  { %2869 = vadd.xlane.f32.xlu0 %v2868_v6 }
0x1542   :  { %2879 = vrot.lane.b32.xlu0 %v5728_v17, %s5136_s27 }
0x1546   :  { %3195 = vrot.lane.b32.xlu0 %v5733_v35, %s5137_s17 }
0x155e   :  { %v2850_v8 = vpop.f32.mrb[24].mxu1 }
0x155f   :  { %v4795_v9 = vpop.f32.mrb[25].mxu1  ;;  %v2855_v11 = vmul.f32 0.25, %v2850_v8 }
0x1561   :  { %v2859_v12 = vsel %vm339_vm3, %v2855_v11, -inf }
0x1565   :  { %2860 = vmax.xlane.f32.xlu0 %v2859_v12 }
0x157b   :  { %2956 = vrot.lane.b32.xlu0 %v5735_v39, %s5136_s27 }
0x157f   :  { %3295 = vrot.lane.b32.xlu0 %v5728_v17, %s5138_s18 }
0x1583   :  { %3532 = vrot.lane.b32.xlu0 %v5726_v15, %s6115_s26 }
0x1587   :  { %3610 = vrot.lane.b32.xlu0 %v5733_v35, %s6115_s26 }
0x158b   :  { %3530 = vrot.lane.b32.xlu0 %v5726_v15, %s6116_s16 }
0x158f   :  { %3608 = vrot.lane.b32.xlu0 %v5733_v35, %s6116_s16  ;;  %v3194_v35 = vpop.permute.xlu1 %3193 }
0x15b9   :  { %v2870_v13 = vpop.xlane.xlu0 %2869 }
0x15ba   :  { %5102 = vrcp.f32 %v2870_v13 }
0x15bd   :  { %v2880_v14 = vpop.permute.xlu0 %2879 }
0x15be   :  { %4797 = vmatpush3.msra.mxu0 %v2880_v14 }
0x15bf   :  { %4813 = vmatprep.subr.mxu0 %v5132_v3 }
0x15c1   :  { %v3196_v15 = vpop.permute.xlu0 %3195 }
0x15c4   :  { %v5103_v18 = vpop.eup %5102 }
0x15c5   :  { %v2876_v19 = vmul.f32 %v5103_v18, %v5101_v41 }
0x15c7   :  { %4799 = vmatmul.mubr.msk.f32.vlgmr.msra.gmra.mrb[38].mxu0 %vm339_vm3, %v2876_v19 }
0x15c8   :  { %4814 = vmatpush3.xpose.msk.msra.mxu0 %vm185_vm2, %v3118_v16  ;;  %4815 = vmatprep.mubr.msk.f32.mxu0 %vm5133_vm1, %v5132_v3 }
0x15c9   :  { %4818 = vmatprep.subr.mxu0 %v5132_v3 }
0x15cb   :  { %4816 = vmatmul.mubr.msk.f32.vlgmr.msra.gmra.mrb[40].mxu0 %vm185_vm2, %v3116_v22 }
0x15cc   :  { %4819 = vmatpush3.xpose.msk.msra.mxu0 %vm185_vm2, %v3196_v15  ;;  %4820 = vmatprep.mubr.msk.f32.mxu0 %vm5133_vm1, %v5132_v3 }
0x15cd   :  { %4828 = vmatprep.subr.mxu0 %v5132_v3 }
0x15cf   :  { %4821 = vmatmul.mubr.msk.f32.vlgmr.msra.gmra.mrb[42].mxu0 %vm185_vm2, %v3194_v35 }
0x15d0   :  { %4830 = vmatprep.mubr.msk.f32.mxu0 %vm5133_vm1, %v5132_v3 }
0x15f2   :  { %v2861_v25 = vpop.xlane.xlu0 %2860 }
0x15f3   :  { %v2863_v26 = vsub.f32 %v2855_v11, %v2861_v25 }
0x15f5   :  { %v2866_v23 = vmul.f32 1.442695, %v2863_v26 }
0x15f6   :  { %v2957_v24 = vpop.permute.xlu0 %2956 }
0x15f7   :  { %5104 = vpow2.f32 %v2866_v23  ;;  %4802 = vmatpush3.msra.mxu1 %v2957_v24 }
0x15f8   :  { %4968 = vmatprep.subr.bf16.mxu1 %v4967_v50 }
0x15fa   :  { %v3296_v37 = vpop.permute.xlu0 %3295 }
0x15fe   :  { %v3533_v4 = vpop.permute.xlu0 %3532 }
0x1601   :  { %v5105_v27 = vpop.eup %5104 }
0x1602   :  { %v2871_v28 = vsel %vm339_vm3, %v5105_v27, 0.0  ;;  %v3611_v8 = vpop.permute.xlu0 %3610 }
0x1603   :  { %2872 = vadd.xlane.f32.xlu1 %v2871_v28 }
0x1606   :  { %v3531_v11 = vpop.permute.xlu0 %3530 }
0x160a   :  { %v3609_v18 = vpop.permute.xlu0 %3608 }
0x1690   :  { %v2873_v30 = vpop.xlane.xlu1 %2872 }
0x1691   :  { %5106 = vrcp.f32 %v2873_v30 }
0x169a   :  { %v2951_v32 = vpop.f32.mrb[38].mxu0 }
0x169b   :  { %v5107_v33 = vpop.eup %5106  ;;  %v4800_v34 = vpop.f32.mrb[39].mxu0 }
0x169c   :  { %v2877_v36 = vmul.f32 %v5107_v33, %v5105_v27 }
0x169e   :  { %4804 = vmatmul.mubr.msk.f32.vlgmr.msra.gmra.mrb[26].mxu1 %vm339_vm3, %v2877_v36  ;;  %v3189_v38 = vpop.f32.mrb[40].mxu0 }
0x169f   :  { %v3271_v40 = vmul.f32 0.25, %v3189_v38  ;;  %4810 = vmatprep.mubr.msk.f32.mxu1 %vm185_vm2, %v2951_v32  ;;  %v4817_v42 = vpop.f32.mrb[41].mxu0  ;;  %4970 = vmatpush3.bf16.msra.mxu1 %v4967_v50 }
0x16a0   :  { %4823 = vmatprep.subr.mxu1 %v5132_v3 }
0x16a1   :  { %v3273_v43 = vsel %vm339_vm3, %v3271_v40, -inf }
0x16a2   :  { %3274 = vmax.xlane.f32.xlu1 %v3273_v43  ;;  %v3267_v44 = vpop.f32.mrb[42].mxu0 }
0x16a3   :  { %v3272_v45 = vmul.f32 0.25, %v3267_v44  ;;  %v4822_v46 = vpop.f32.mrb[43].mxu0 }
0x16a5   :  { %v3276_v47 = vsel %vm339_vm3, %v3272_v45, -inf }
0x16a6   :  { %3277 = vmax.xlane.f32.xlu1 %v3276_v47  ;;  %v4381_v47 = vld [vmem:[%s6098_s3 + $0x78] sm:$0xff] }
0x172f   :  { %v3275_v51 = vpop.xlane.xlu1 %3274 }
0x1730   :  { %v3279_v20 = vsub.f32 %v3271_v40, %v3275_v51 }
0x1732   :  { %v3281_v21 = vmul.f32 1.442695, %v3279_v20 }
0x1733   :  { %v3278_v52 = vpop.xlane.xlu1 %3277 }
0x1734   :  { %5108 = vpow2.f32 %v3281_v21  ;;  %v3280_v53 = vsub.f32 %v3272_v45, %v3278_v52 }
0x1736   :  { %v3283_v54 = vmul.f32 1.442695, %v3280_v53 }
0x1738   :  { %5110 = vpow2.f32 %v3283_v54  ;;  %v4383_v54 = vld [vmem:[%s6099_s4 + $0x1] ss:$0 sm:$0xff] }
0x173e   :  { %v5109_v55 = vpop.eup %5108 }
0x173f   :  { %v3285_v56 = vsel %vm339_vm3, %v5109_v55, 0.0 }
0x1740   :  { %3286 = vadd.xlane.f32.xlu1 %v3285_v56 }
0x1742   :  { %v5111_v57 = vpop.eup %5110 }
0x1743   :  { %v3288_v58 = vsel %vm339_vm3, %v5111_v57, 0.0 }
0x1744   :  { %3289 = vadd.xlane.f32.xlu1 %v3288_v58 }
0x1755   :  { %3371 = vrot.lane.b32.xlu1 %v5735_v39, %s5138_s18 }
0x1771   :  { %v3028_v62 = vpop.f32.mrb[26].mxu1 }
0x1772   :  { %v4805_v63 = vpop.f32.mrb[27].mxu1  ;;  %4811 = vmatmul.mubr.msk.f32.vlgmr.msra.gmra.mrb[22].mxu1 %vm185_vm2, %v3028_v62 }
0x1773   :  { %4824 = vmatpush3.msra.mxu1 %v3296_v37  ;;  %4825 = vmatprep.mubr.msk.f32.mxu1 %vm5133_vm1, %v5132_v3 }
0x1774   :  { %4972 = vmatprep.subr.bf16.mxu1 %v4971_v61 }
0x17cd   :  { %v3287_v0 = vpop.xlane.xlu1 %3286 }
0x17ce   :  { %5112 = vrcp.f32 %v3287_v0 }
0x17d1   :  { %v3290_v1 = vpop.xlane.xlu1 %3289 }
0x17d2   :  { %5114 = vrcp.f32 %v3290_v1 }
0x17d5   :  { %v3372_v2 = vpop.permute.xlu1 %3371 }
0x17d6   :  { %4829 = vmatpush3.msra.mxu0 %v3372_v2 }
0x17d7   :  { %4840 = vmatprep.subr.mxu0 %v5132_v3 }
0x17d8   :  { %v5113_v5 = vpop.eup %5112 }
0x17d9   :  { %v3293_v41 = vmul.f32 %v5113_v5, %v5109_v55 }
0x17db   :  { %4826 = vmatmul.mubr.msk.f32.vlgmr.msra.gmra.mrb[28].mxu1 %vm339_vm3, %v3293_v41 }
0x17dc   :  { %v5115_v6 = vpop.eup %5114  ;;  %4974 = vmatpush3.bf16.msra.mxu1 %v4971_v61 }
0x17dd   :  { %v3294_v9 = vmul.f32 %v5115_v6, %v5111_v57  ;;  %4845 = vmatprep.subr.mxu1 %v5132_v3  ;;  %v4421_v6 = vld [vmem:[%s6100_s7 + $0x88] sm:$0xff] }
0x17df   :  { %4831 = vmatmul.mubr.msk.f32.vlgmr.msra.gmra.mrb[44].mxu0 %vm339_vm3, %v3294_v9 }
0x17e0   :  { %4841 = vmatpush3.xpose.msk.msra.mxu0 %vm185_vm2, %v3533_v4  ;;  %4842 = vmatprep.mubr.msk.f32.mxu0 %vm5133_vm1, %v5132_v3 }
0x17e1   :  { %4850 = vmatprep.subr.mxu0 %v5132_v3 }
0x17e3   :  { %4843 = vmatmul.mubr.msk.f32.vlgmr.msra.gmra.mrb[46].mxu0 %vm185_vm2, %v3531_v11  ;;  %v4420_v11 = vld [vmem:[%s6100_s7 + $0x80] sm:$0xff] }
0x17e4   :  { %4852 = vmatprep.mubr.msk.f32.mxu0 %vm5133_vm1, %v5132_v3 }
0x18ae   :  { %v3367_v12 = vpop.f32.mrb[28].mxu1 }
0x18af   :  { %v4827_v13 = vpop.f32.mrb[29].mxu1  ;;  %4837 = vmatprep.mubr.msk.f32.mxu1 %vm185_vm2, %v3367_v12  ;;  %v4422_v12 = vld [vmem:[%s6100_s7 + $0x90] sm:$0xff] }
0x18b0   :  { %v4981_v13 = vpack.c.bf16 %v4422_v12, %v4420_v11 }
0x18b2   :  { %v3443_v14 = vpop.f32.mrb[44].mxu0 }
0x18b3   :  { %v4832_v16 = vpop.f32.mrb[45].mxu0  ;;  %4838 = vmatmul.mubr.msk.f32.vlgmr.msra.gmra.mrb[22].mxu1 %vm185_vm2, %v3443_v14  ;;  %v4425_v14 = vld [vmem:[%s6100_s7 + $0xa8] sm:$0xff] }
0x18b4   :  { %4846 = vmatpush3.xpose.msk.msra.mxu1 %vm185_vm2, %v3611_v8  ;;  %4847 = vmatprep.mubr.msk.f32.mxu1 %vm5133_vm1, %v5132_v3  ;;  %v4423_v8 = vld [vmem:[%s6100_s7 + $0x98] sm:$0xff] }
0x18b5   :  { %4855 = vmatprep.subr.mxu1 %v5132_v3  ;;  %v4979_v9 = vpack.c.bf16 %v4423_v8, %v4421_v6  ;;  %v4427_v16 = vld [vmem:[%s6100_s7 + $0xb8] sm:$0xff]  ;;  %v4467_v6 = vld [vmem:[%s6101_s9 + $0x1e0] sm:$0xff]  ;;  %v4468_v8 = vld [vmem:[%s6101_s9 + $0x1e8] sm:$0xff] }
0x18b6   :  { %v3604_v19 = vpop.f32.mrb[46].mxu0  ;;  %v5019_v11 = vpack.c.bf16 %v4468_v8, %v4467_v6 }
0x18b7   :  { %v3686_v22 = vmul.f32 0.25, %v3604_v19  ;;  %v4844_v15 = vpop.f32.mrb[47].mxu0  ;;  %4848 = vmatmul.mubr.msk.f32.vlgmr.msra.gmra.mrb[30].mxu1 %vm185_vm2, %v3609_v18  ;;  %v4983_v18 = vpack.c.bf16 %v4427_v16, %v4425_v14  ;;  %v4424_v19 = vld [vmem:[%s6100_s7 + $0xa0] sm:$0xff] }
0x18b8   :  { %4857 = vmatprep.mubr.msk.f32.mxu1 %vm5133_vm1, %v5132_v3 }
0x18b9   :  { %v3688_v35 = vsel %vm339_vm3, %v3686_v22, -inf }
0x18ba   :  { %3689 = vmax.xlane.f32.xlu1 %v3688_v35  ;;  %v4429_v35 = vld [vmem:[%s6100_s7 + $0xc8] sm:$0xff] }
0x1947   :  { %v3690_v25 = vpop.xlane.xlu1 %3689 }
0x1948   :  { %v3694_v26 = vsub.f32 %v3686_v22, %v3690_v25  ;;  %v4426_v22 = vld [vmem:[%s6100_s7 + $0xb0] sm:$0xff]  ;;  %v4431_v25 = vld [vmem:[%s6100_s7 + $0xd8] sm:$0xff] }
0x1949   :  { %v4985_v15 = vpack.c.bf16 %v4426_v22, %v4424_v19 }
0x194a   :  { %v3696_v23 = vmul.f32 1.442695, %v3694_v26  ;;  %v4987_v26 = vpack.c.bf16 %v4431_v25, %v4429_v35  ;;  %v4418_v35 = vld [vmem:[%s6102_s5 + $0x1] ss:$0 sm:$0xff] }
0x194c   :  { %5116 = vpow2.f32 %v3696_v23  ;;  %v4428_v23 = vld [vmem:[%s6100_s7 + $0xc0] sm:$0xff] }
0x1956   :  { %v5117_v32 = vpop.eup %5116 }
0x1957   :  { %v3700_v33 = vsel %vm339_vm3, %v5117_v32, 0.0 }
0x198a   :  { %v3682_v24 = vpop.f32.mrb[30].mxu1 }
0x198b   :  { %v3687_v27 = vmul.f32 0.25, %v3682_v24  ;;  %v4849_v28 = vpop.f32.mrb[31].mxu1  ;;  %v4430_v24 = vld [vmem:[%s6100_s7 + $0xd0] sm:$0xff] }
0x198c   :  { %v4433_v28 = vld [vmem:[%s6100_s7 + $0xe8] sm:$0xff] }
0x198d   :  { %v3691_v30 = vsel %vm339_vm3, %v3687_v27, -inf }
0x198e   :  { %3692 = vmax.xlane.f32.xlu0 %v3691_v30  ;;  %v4435_v30 = vld [vmem:[%s6100_s7 + $0xf8] sm:$0xff] }
0x1992   :  { %3701 = vadd.xlane.f32.xlu0 %v3700_v33  ;;  %v4991_v33 = vpack.c.bf16 %v4435_v30, %v4433_v28 }
0x19a8   :  { %3710 = vrot.lane.b32.xlu0 %v5728_v17, %s6116_s16  ;;  %v4380_v17 = vld [vmem:[%s6098_s3 + $0x70] sm:$0xff] }
0x19a9   :  { %v4975_v49 = vpack.c.bf16 %v4381_v47, %v4380_v17 }
0x1a1b   :  { %v3693_v34 = vpop.xlane.xlu0 %3692 }
0x1a1c   :  { %v3695_v36 = vsub.f32 %v3687_v27, %v3693_v34  ;;  %v4989_v27 = vpack.c.bf16 %v4430_v24, %v4428_v23  ;;  %v4434_v34 = vld [vmem:[%s6100_s7 + $0xf0] sm:$0xff]  ;;  %v4419_v23 = vld [vmem:[%s6103_s6 + $0x1] ss:$0 sm:$0xff] }
0x1a1e   :  { %v3698_v38 = vmul.f32 1.442695, %v3695_v36 }
0x1a1f   :  { %v3702_v40 = vpop.xlane.xlu0 %3701 }
0x1a20   :  { %5118 = vpow2.f32 %v3698_v38  ;;  %v4455_v38 = vld [vmem:[%s6101_s9 + $0x180] sm:$0xff] }
0x1a21   :  { %5120 = vrcp.f32 %v3702_v40  ;;  %v4456_v40 = vld [vmem:[%s6101_s9 + $0x188] sm:$0xff] }
0x1a23   :  { %v3711_v42 = vpop.permute.xlu0 %3710 }
0x1a24   :  { %4851 = vmatpush3.msra.mxu0 %v3711_v42  ;;  %v4439_v42 = vld [vmem:[%s6101_s9 + $0x100] sm:$0xff] }
0x1a25   :  { %4980 = vmatprep.subr.bf16.mxu0 %v4979_v9 }
0x1a2a   :  { %v5119_v43 = vpop.eup %5118 }
0x1a2b   :  { %v5121_v44 = vpop.eup %5120  ;;  %v3703_v45 = vsel %vm339_vm3, %v5119_v43, 0.0 }
0x1a2c   :  { %v3708_v46 = vmul.f32 %v5121_v44, %v5117_v32  ;;  %3704 = vadd.xlane.f32.xlu1 %v3703_v45  ;;  %v4432_v32 = vld [vmem:[%s6100_s7 + $0xe0] sm:$0xff]  ;;  %v4440_v44 = vld [vmem:[%s6101_s9 + $0x108] sm:$0xff]  ;;  %v4457_v45 = vld [vmem:[%s6101_s9 + $0x190] sm:$0xff] }
0x1a2d   :  { %v4993_v36 = vpack.c.bf16 %v4434_v34, %v4432_v32  ;;  %v4997_v17 = vpack.c.bf16 %v4440_v44, %v4439_v42  ;;  %v4436_v42 = vld [vmem:[%s6104_s8 + $0x2] sm:$0x3] }
0x1a2e   :  { %4853 = vmatmul.mubr.msk.f32.vlgmr.msra.gmra.mrb[48].mxu0 %vm339_vm3, %v3708_v46  ;;  %v4458_v46 = vld [vmem:[%s6101_s9 + $0x198] sm:$0xff]  ;;  %v4020_v44 = vrot.slane %v4436_v42, %v5296_v31 }
0x1a2f   :  { %4093 = vmatprep.mubr.f32.mxu0 %v5132_v3  ;;  %4982 = vmatpush1.bf16.msra.mxu0 %v4981_v13  ;;  %v4999_v47 = vpack.c.bf16 %v4458_v46, %v4457_v45 }
0x1a30   :  { %4984 = vmatprep.subr.bf16.mxu0 %v4983_v18 }
0x1a33   :  { %4986 = vmatpush1.bf16.msra.mxu0 %v4985_v15 }
0x1a34   :  { %4988 = vmatprep.subr.bf16.mxu0 %v4987_v26 }
0x1a37   :  { %4990 = vmatpush1.bf16.msra.mxu0 %v4989_v27 }
0x1a38   :  { %4992 = vmatprep.subr.bf16.mxu0 %v4991_v33  ;;  %v4469_v33 = vld [vmem:[%s6101_s9 + $0x1f0] sm:$0xff] }
0x1a3b   :  { %4994 = vmatpush1.bf16.msra.mxu0 %v4993_v36  ;;  %v4453_v36 = vld [vmem:[%s6101_s9 + $0x170] sm:$0xff] }
0x1a3d   :  { %3786 = vrot.lane.b32.xlu1 %v5735_v39, %s6116_s16 }
0x1ab9   :  { %v3705_v48 = vpop.xlane.xlu1 %3704 }
0x1aba   :  { %5122 = vrcp.f32 %v3705_v48  ;;  %v4441_v48 = vld [vmem:[%s6101_s9 + $0x110] sm:$0xff] }
0x1abd   :  { %v3787_v50 = vpop.permute.xlu1 %3786 }
0x1abe   :  { %4856 = vmatpush3.msra.mxu1 %v3787_v50  ;;  %v4459_v50 = vld [vmem:[%s6101_s9 + $0x1a0] sm:$0xff] }
0x1abf   :  { %4976 = vmatprep.subr.bf16.mxu1 %v4975_v49 }
0x1ac4   :  { %v5123_v51 = vpop.eup %5122 }
0x1ac5   :  { %v3709_v20 = vmul.f32 %v5123_v51, %v5119_v43  ;;  %v4995_v43 = vpack.c.bf16 %v4456_v40, %v4455_v38  ;;  %v4460_v51 = vld [vmem:[%s6101_s9 + $0x1a8] sm:$0xff]  ;;  %v4454_v38 = vld [vmem:[%s6101_s9 + $0x178] sm:$0xff] }
0x1ac6   :  { %v5025_v40 = vpack.c.bf16 %v4454_v38, %v4453_v36 }
0x1ac7   :  { %4858 = vmatmul.mubr.msk.f32.vlgmr.msra.gmra.mrb[32].mxu1 %vm339_vm3, %v3709_v20 }
0x1ac8   :  { %4978 = vmatpush3.bf16.msra.mxu1 %v4975_v49  ;;  %v4442_v49 = vld [vmem:[%s6101_s9 + $0x118] sm:$0xff] }
0x1ac9   :  { %4996 = vmatprep.subr.bf16.mxu1 %v4995_v43  ;;  %v5001_v20 = vpack.c.bf16 %v4442_v49, %v4441_v48  ;;  %v4016_v43 = vrot.slane %v4436_v42, %v5291_v29  ;;  %v4472_v29 = vld [vmem:[%s6105_s10 + $0x1] ss:$0 sm:$0xff] }
0x1b01   :  { %v3782_v39 = vpop.f32.mrb[48].mxu0 }
0x1b02   :  { %v4854_v21 = vpop.f32.mrb[49].mxu0  ;;  %4864 = vmatprep.mubr.msk.f32.mxu1 %vm185_vm2, %v3782_v39  ;;  %v5003_v39 = vpack.c.bf16 %v4460_v51, %v4459_v50 }
0x1b03   :  { %v4443_v21 = vld [vmem:[%s6101_s9 + $0x120] sm:$0xff] }
0x1b9a   :  { %v3858_v52 = vpop.f32.mrb[32].mxu1 }
0x1b9b   :  { %v4859_v53 = vpop.f32.mrb[33].mxu1  ;;  %4865 = vmatmul.mubr.msk.f32.vlgmr.msra.gmra.mrb[22].mxu1 %vm185_vm2, %v3858_v52  ;;  %v4444_v52 = vld [vmem:[%s6101_s9 + $0x128] sm:$0xff] }
0x1b9c   :  { %4998 = vmatpush3.bf16.msra.mxu1 %v4997_v17  ;;  %v4461_v53 = vld [vmem:[%s6101_s9 + $0x1b0] sm:$0xff] }
0x1b9d   :  { %5000 = vmatprep.subr.bf16.mxu1 %v4999_v47 }
0x1ba0   :  { %5002 = vmatpush3.bf16.msra.mxu1 %v5001_v20 }
0x1ba1   :  { %5004 = vmatprep.subr.bf16.mxu1 %v5003_v39 }
0x1c6e   :  { %v4866_v55 = vpop.f32.mrb[22].mxu1 }
0x1c6f   :  { %v5029_v56 = vadd.f32 %v4866_v55, %v4383_v54  ;;  %v3934_v57 = vpop.f32.mrb[23].mxu1  ;;  %v5005_v55 = vpack.c.bf16 %v4444_v52, %v4443_v21 }
0x1c70   :  { %v5030_v58 = vadd.f32 %v4383_v54, %v3934_v57  ;;  %v4462_v54 = vld [vmem:[%s6101_s9 + $0x1b8] sm:$0xff]  ;;  %v4445_v57 = vld [vmem:[%s6101_s9 + $0x130] sm:$0xff] }
0x1c71   :  { %v3946_v59 = vadd.f32 %v5029_v56, %v5715_v10  ;;  %v5007_v56 = vpack.c.bf16 %v4462_v54, %v4461_v53  ;;  %5006 = vmatpush3.bf16.msra.mxu1 %v5005_v55 }
0x1c72   :  { %v3945_v60 = vadd.f32 %v5030_v58, %v5710_v7  ;;  %v4446_v58 = vld [vmem:[%s6101_s9 + $0x138] sm:$0xff] }
0x1c73   :  { %v3954_v61 = vsel %vm82_vm0, %v3946_v59, 0.0  ;;  %5008 = vmatprep.subr.bf16.mxu1 %v5007_v56 }
0x1c74   :  { %3955 = vadd.xlane.f32.xlu0 %v3954_v61  ;;  %v3951_v62 = vsel %vm82_vm0, %v3945_v60, 0.0  ;;  %v5009_v61 = vpack.c.bf16 %v4446_v58, %v4445_v57 }
0x1c75   :  { %3952 = vadd.xlane.f32.xlu1 %v3951_v62 }
0x1c76   :  { %5010 = vmatpush3.bf16.msra.mxu1 %v5009_v61 }
0x1d01   :  { %v3956_v37 = vpop.xlane.xlu0 %3955 }
0x1d02   :  { %v3958_v63 = vmul.f32 0.015625, %v3956_v37  ;;  %v3953_v0 = vpop.xlane.xlu1 %3952  ;;  %v4447_v37 = vld [vmem:[%s6101_s9 + $0x140] sm:$0xff] }
0x1d03   :  { %v3957_v1 = vmul.f32 0.015625, %v3953_v0  ;;  %v4465_v0 = vld [vmem:[%s6101_s9 + $0x1d0] sm:$0xff] }
0x1d04   :  { %v5900_v2 = vsub.f32 %v3946_v59, %v3958_v63  ;;  %v4463_v59 = vld [vmem:[%s6101_s9 + $0x1c0] sm:$0xff]  ;;  %v4448_v63 = vld [vmem:[%s6101_s9 + $0x148] sm:$0xff] }
0x1d05   :  { %v5902_v4 = vsub.f32 %v3945_v60, %v3957_v1  ;;  %v4464_v60 = vld [vmem:[%s6101_s9 + $0x1c8] sm:$0xff]  ;;  %v4466_v1 = vld [vmem:[%s6101_s9 + $0x1d8] sm:$0xff] }
0x1d06   :  { %v3962_v5 = vmul.f32 %v5900_v2, %v5900_v2  ;;  %v5011_v62 = vpack.c.bf16 %v4464_v60, %v4463_v59 }
0x1d07   :  { %v3961_v7 = vmul.f32 %v5902_v4, %v5902_v4 }
0x1d08   :  { %v3966_v10 = vsel %vm82_vm0, %v3962_v5, 0.0  ;;  %v5013_v5 = vpack.c.bf16 %v4448_v63, %v4447_v37  ;;  %5012 = vmatprep.subr.bf16.mxu1 %v5011_v62 }
0x1d09   :  { %3967 = vadd.xlane.f32.xlu1 %v3966_v10  ;;  %v3963_v41 = vsel %vm82_vm0, %v3961_v7, 0.0  ;;  %v5015_v7 = vpack.c.bf16 %v4466_v1, %v4465_v0  ;;  %v4449_v10 = vld [vmem:[%s6101_s9 + $0x150] sm:$0xff] }
0x1d0a   :  { %3964 = vadd.xlane.f32.xlu0 %v3963_v41  ;;  %v4450_v41 = vld [vmem:[%s6101_s9 + $0x158] sm:$0xff]  ;;  %5014 = vmatpush3.bf16.msra.mxu1 %v5013_v5 }
0x1d0b   :  { %v5017_v9 = vpack.c.bf16 %v4450_v41, %v4449_v10  ;;  %5016 = vmatprep.subr.bf16.mxu1 %v5015_v7 }
0x1d0e   :  { %5018 = vmatpush3.bf16.msra.mxu1 %v5017_v9 }
0x1d0f   :  { %5020 = vmatprep.subr.bf16.mxu1 %v5019_v11  ;;  %v20_v11 = vstv %s6108_s14 }
0x1d10   :  { %21 = vst [vmem:[#allocation2] sm:$0x1] %v20_v11 }
0x1d17   :  { %v4478_v36 = vld [vmem:[#allocation2] ss:$0 sm:$0xff] }
0x1d96   :  { %v3968_v12 = vpop.xlane.xlu1 %3967 }
0x1d97   :  { %v3970_v13 = vmul.f32 0.015625, %v3968_v12  ;;  %v3965_v14 = vpop.xlane.xlu0 %3964 }
0x1d98   :  { %v3969_v16 = vmul.f32 0.015625, %v3965_v14 }
0x1d99   :  { %v3972_v18 = vadd.f32 1e-05, %v3970_v13 }
0x1d9a   :  { %v3971_v19 = vadd.f32 1e-05, %v3969_v16 }
0x1d9b   :  { %5124 = vrsqrt.f32 %v3972_v18 }
0x1d9c   :  { %5126 = vrsqrt.f32 %v3971_v19 }
0x1da5   :  { %v5125_v22 = vpop.eup %5124 }
0x1da6   :  { %v5127_v15 = vpop.eup %5126  ;;  %v3976_v26 = vmul.f32 %v5125_v22, %v5900_v2  ;;  %v4452_v2 = vld [vmem:[%s6101_s9 + $0x168] sm:$0xff] }
0x1da7   :  { %v3975_v25 = vmul.f32 %v5127_v15, %v5902_v4  ;;  %v4451_v4 = vld [vmem:[%s6101_s9 + $0x160] sm:$0xff] }
0x1da8   :  { %v3984_v28 = vmul.f32 %v4418_v35, %v3976_v26  ;;  %v5021_v32 = vpack.c.bf16 %v4452_v2, %v4451_v4  ;;  %v4475_v15 = vld [vmem:[%s6106_s11 + $0x1] ss:$0 sm:$0xff] }
0x1da9   :  { %v3983_v24 = vmul.f32 %v4418_v35, %v3975_v25  ;;  %v4476_v25 = vld [vmem:[%s6107_s12 + $0x1] ss:$0 sm:$0xff] }
0x1daa   :  { %v3992_v30 = vadd.f32 %v4419_v23, %v3984_v28  ;;  %5022 = vmatpush3.bf16.msra.mxu1 %v5021_v32 }
0x1dab   :  { %v3991_v27 = vadd.f32 %v4419_v23, %v3983_v24  ;;  %v4477_v24 = vld [vmem:[%s6109_s13] ss:$0 sm:$0xff] }
0x1dad   :  { %4437 = vmatmul.mubr.msk.f32.vlgmr.msra.gmra.mrb[50].mxu0 %vm82_vm0, %v3991_v27 }
0x1dae   :  { %4099 = vmatprep.mubr.f32.mxu0 %v5132_v3  ;;  %v4470_v3 = vld [vmem:[%s6101_s9 + $0x1f8] sm:$0xff] }
0x1daf   :  { %v5023_v34 = vpack.c.bf16 %v4470_v3, %v4469_v33 }
0x1db1   :  { %4438 = vmatmul.mubr.msk.f32.gmra.mrb[52].mxu0 %vm82_vm0, %v3992_v30  ;;  %5024 = vmatprep.subr.bf16.mxu1 %v5023_v34 }
0x1db2   :  { %5026 = vmatpush3.bf16.msra.mxu1 %v5025_v40 }
0x1e80   :  { %v4095_v45 = vpop.f32.mrb[50].mxu0 }
0x1e81   :  { %v4096_v46 = vadd.f32 %v4095_v45, %v4016_v43  ;;  %v4097_v17 = vpop.f32.mrb[51].mxu0 }
0x1e82   :  { %v4098_v47 = vadd.f32 %v4097_v17, %v4020_v44 }
0x1e83   :  { %v4106_v50 = vmax.f32 %v4096_v46, 0.0 }
0x1e84   :  { %v4107_v48 = vmax.f32 %v4098_v47, 0.0  ;;  %v4101_v49 = vpop.f32.mrb[52].mxu0 }
0x1e85   :  { %v4102_v51 = vadd.f32 %v4101_v49, %v4016_v43  ;;  %v4103_v20 = vpop.f32.mrb[53].mxu0 }
0x1e86   :  { %v4104_v39 = vadd.f32 %v4103_v20, %v4020_v44  ;;  %4215 = vmatprep.mubr.f32.mxu1 %v4107_v48 }
0x1e87   :  { %4216 = vmatmul.mubr.f32.vlgmr.msra.gmra.mrb[34].mxu1 %v4106_v50  ;;  %v4108_v52 = vmax.f32 %v4102_v51, 0.0 }
0x1e88   :  { %v4109_v21 = vmax.f32 %v4104_v39, 0.0 }
0x1e8a   :  { %4220 = vmatprep.mubr.f32.mxu1 %v4109_v21 }
0x1e8b   :  { %4221 = vmatmul.mubr.f32.gmra.mrb[36].mxu1 %v4108_v52 }
0x1f5a   :  { %v4645_v53 = vpop.f32.mrb[34].mxu1 }
0x1f5b   :  { %v4646_v31 = vpop.f32.mrb[35].mxu1 }
0x1f5c   :  { %v4647_v54 = vadd.f32 %v4646_v31, %v4645_v53 }
0x1f5e   :  { %v4218_v55 = vadd.f32 %v4647_v54, %v4472_v29  ;;  %v4648_v56 = vpop.f32.mrb[36].mxu1 }
0x1f5f   :  { %v4649_v57 = vpop.f32.mrb[37].mxu1 }
0x1f60   :  { %v4650_v58 = vadd.f32 %v4649_v57, %v4648_v56  ;;  %v4226_v59 = vadd.f32 %v4218_v55, %v3991_v27 }
0x1f62   :  { %v4223_v60 = vadd.f32 %v4650_v58, %v4472_v29  ;;  %v4232_v61 = vsel %vm82_vm0, %v4226_v59, 0.0 }
0x1f63   :  { %4233 = vadd.xlane.f32.xlu1 %v4232_v61 }
0x1f64   :  { %v4227_v62 = vadd.f32 %v4223_v60, %v3992_v30 }
0x1f66   :  { %v4235_v37 = vsel %vm82_vm0, %v4227_v62, 0.0 }
0x1f67   :  { %4236 = vadd.xlane.f32.xlu0 %v4235_v37 }
0x1ff0   :  { %v4234_v63 = vpop.xlane.xlu1 %4233 }
0x1ff1   :  { %v4238_v0 = vmul.f32 0.015625, %v4234_v63 }
0x1ff3   :  { %v4240_v1 = vsub.f32 %v4226_v59, %v4238_v0 }
0x1ff4   :  { %v4237_v5 = vpop.xlane.xlu0 %4236 }
0x1ff5   :  { %v4239_v7 = vmul.f32 0.015625, %v4237_v5  ;;  %v4242_v10 = vmul.f32 %v4240_v1, %v4240_v1 }
0x1ff7   :  { %v4241_v41 = vsub.f32 %v4227_v62, %v4239_v7  ;;  %v4244_v6 = vsel %vm82_vm0, %v4242_v10, 0.0 }
0x1ff8   :  { %4245 = vadd.xlane.f32.xlu1 %v4244_v6 }
0x1ff9   :  { %v4243_v8 = vmul.f32 %v4241_v41, %v4241_v41 }
0x1ffb   :  { %v4247_v9 = vsel %vm82_vm0, %v4243_v8, 0.0 }
0x1ffc   :  { %4248 = vadd.xlane.f32.xlu0 %v4247_v9 }
0x2085   :  { %v4246_v12 = vpop.xlane.xlu1 %4245 }
0x2086   :  { %v4250_v13 = vmul.f32 0.015625, %v4246_v12 }
0x2088   :  { %v4252_v14 = vadd.f32 1e-05, %v4250_v13 }
0x2089   :  { %v4249_v16 = vpop.xlane.xlu0 %4248 }
0x208a   :  { %5128 = vrsqrt.f32 %v4252_v14  ;;  %v4251_v18 = vmul.f32 0.015625, %v4249_v16 }
0x208c   :  { %v4253_v19 = vadd.f32 1e-05, %v4251_v18 }
0x208e   :  { %5130 = vrsqrt.f32 %v4253_v19 }
0x2094   :  { %v5129_v22 = vpop.eup %5128 }
0x2095   :  { %v4256_v35 = vmul.f32 %v5129_v22, %v4240_v1 }
0x2097   :  { %v4264_v26 = vmul.f32 %v4475_v15, %v4256_v35 }
0x2098   :  { %v5131_v23 = vpop.eup %5130 }
0x2099   :  { %v4272_v27 = vadd.f32 %v4476_v25, %v4264_v26  ;;  %v4257_v28 = vmul.f32 %v5131_v23, %v4241_v41 }
0x209b   :  { %v4281_v30 = vmul.f32 %v4477_v24, %v4272_v27  ;;  %v4265_v4 = vmul.f32 %v4475_v15, %v4257_v28 }
0x209d   :  { %v4289_v2 = vsel %vm4288_vm4, %v4281_v30, 0.0  ;;  %v4273_v32 = vadd.f32 %v4476_v25, %v4265_v4 }
0x209e   :  { %4290 = vadd.xlane.f32.xlu0 %v4289_v2 }
0x209f   :  { %v4282_v33 = vmul.f32 %v4477_v24, %v4273_v32 }
0x20a1   :  { %v4285_v3 = vrot.slane %v4282_v33, 7 }
0x20a3   :  { %v4293_v34 = vsel %vm4292_vm5, %v4285_v3, 0.0 }
0x20a4   :  { %4294 = vadd.xlane.f32.xlu1 %v4293_v34 }
0x212b   :  { %v4291_v38 = vpop.xlane.xlu0 %4290 }
0x212c   :  { %v4303_v40 = vadd.f32 %v4478_v36, %v4291_v38 }
0x212e   :  { %4306 = vst.msk [vmem:[%s6110_s15 - $0x7] sm:$0x80] %vm4305_vm6, %v4303_v40 }
0x2131   :  { %v4295_v42 = vpop.xlane.xlu1 %4294 }
0x2132   :  { %v4304_v43 = vadd.f32 %v4478_v36, %v4295_v42 }
0x2134   :  { %4308 = vst.msk [vmem:[%s6110_s15 + $0x1] sm:$0x1] %vm4307_vm7, %v4304_v43 }

</bundles_post_ra>
